<compile_context>
chip_gen: v6e
topology: v6e:2x2x1
jax: 0.10.0
libtpu: 0.0.40
codegen_flags: <defaults>
</compile_context>

<pallas_src>
import math
from functools import partial

import numpy as np
import jax
import jax.numpy as jnp
from jax import lax
from jax.experimental import pallas as pl
from jax.experimental.pallas import tpu as pltpu


# ----------------------------------------------------------------------------
# sincos positional embedding (same math as the PyTorch reference, in numpy)
# ----------------------------------------------------------------------------
def get_1d_sincos_pos_embed_from_grid(embed_dim, pos):
    assert embed_dim % 2 == 0
    omega = np.arange(embed_dim // 2, dtype=np.float32)
    omega /= embed_dim / 2.0
    omega = 1.0 / 10000 ** omega
    pos = pos.reshape(-1)
    out = np.einsum("m,d->md", pos, omega)
    return np.concatenate([np.sin(out), np.cos(out)], axis=1)


def get_2d_sincos_pos_embed_from_grid(embed_dim, grid):
    assert embed_dim % 2 == 0
    emb_h = get_1d_sincos_pos_embed_from_grid(embed_dim // 2, grid[0])
    emb_w = get_1d_sincos_pos_embed_from_grid(embed_dim // 2, grid[1])
    return np.concatenate([emb_h, emb_w], axis=1)


def get_2d_sincos_pos_embed(embed_dim, grid_size):
    grid_h = np.arange(grid_size, dtype=np.float32)
    grid_w = np.arange(grid_size, dtype=np.float32)
    grid = np.meshgrid(grid_w, grid_h)
    grid = np.stack(grid, axis=0).reshape([2, 1, grid_size, grid_size])
    return get_2d_sincos_pos_embed_from_grid(embed_dim, grid)


def get_abs_pos(abs_pos, tgt_size):
    # TODO(synk): jax.image.resize bicubic can differ slightly from
    # F.interpolate(mode='bicubic', align_corners=False) when downsampling
    # (antialiasing); for same-size / upsampling it matches. Same-size here.
    src = int(math.sqrt(abs_pos.shape[0]))
    e = abs_pos.shape[1]
    grid = abs_pos.reshape(src, src, e)
    resized = jax.image.resize(grid, (tgt_size[0], tgt_size[1], e), method="bicubic")
    return resized.reshape(-1, e)


# ----------------------------------------------------------------------------
# Pallas kernel: block_b batch elements per grid step
# ----------------------------------------------------------------------------
def _resampler_kernel(x_ref, q_ref, poskv_ref, kvw_ref,
                      g1_ref, b1_ref,
                      wk_ref, bk_ref, wv_ref, bv_ref,
                      wo_ref, bo_ref,
                      g2_ref, b2_ref, proj_ref,
                      out_ref, att_ref, *,
                      eps, compute_dtype, approx_recip):
    cdt = compute_dtype

    def c(t):  # cast matmul operands to compute dtype (bf16 in perf mode)
        return t.astype(cdt)

    def layernorm(t, g, b):  # always f32
        mu = jnp.mean(t, axis=-1, keepdims=True)
        var = jnp.mean((t - mu) ** 2, axis=-1, keepdims=True)
        return (t - mu) * lax.rsqrt(var + eps) * g + b

    Bb, L, Dkv = x_ref.shape
    H, Q, hd = q_ref.shape
    E = wk_ref.shape[1]

    # ---- kv_proj + ln_kv on flattened (Bb*L, .) rows (fills MXU rows) ----
    x2 = x_ref[...].reshape(Bb * L, Dkv)
    xk = jnp.dot(c(x2), kvw_ref[...], preferred_element_type=jnp.float32)
    xk = layernorm(xk, g1_ref[...], b1_ref[...])                     # (Bb*L, E) f32

    # k/v input projections on flattened rows; pos-emb added per batch element
    k_in = (xk.reshape(Bb, L, E) + poskv_ref[...][None]).reshape(Bb * L, E)
    k = jnp.dot(c(k_in), wk_ref[...], preferred_element_type=jnp.float32) + bk_ref[...]
    v = jnp.dot(c(xk), wv_ref[...], preferred_element_type=jnp.float32) + bv_ref[...]

    q_all = q_ref[...]                                               # (H, Q, hd) pre-scaled

    # ---- per (batch, head) attention; head outputs written directly into the
    #      VMEM scratch slab (no concatenate / relayout) ----
    for b in range(Bb):
        kb = k[b * L:(b + 1) * L, :]
        vb = v[b * L:(b + 1) * L, :]
        for h in range(H):
            qh = q_all[h]                                            # (Q, hd)
            kh = c(kb[:, h * hd:(h + 1) * hd])                       # (L, hd)
            vh = c(vb[:, h * hd:(h + 1) * hd])                       # (L, hd)
            s = lax.dot_general(qh, kh, (((1,), (1,)), ((), ())),
                                preferred_element_type=jnp.float32)  # (Q, L)
            s = s - jnp.max(s, axis=-1, keepdims=True)
            p = jnp.exp(s)
            denom = jnp.sum(p, axis=-1, keepdims=True)
            if approx_recip:
                inv = pl.reciprocal(denom, approx=True)              # EUP slot
            else:
                inv = 1.0 / denom                                    # one divide / row
            p = p * inv
            att_ref[b * Q:(b + 1) * Q, h * hd:(h + 1) * hd] = jnp.dot(
                c(p), vh, preferred_element_type=jnp.float32)

    # ---- out-proj + ln_post + final proj on the flattened (Bb*Q, E) slab ----
    oo = jnp.dot(c(att_ref[...]), wo_ref[...],
                 preferred_element_type=jnp.float32) + bo_ref[...]
    oo = layernorm(oo, g2_ref[...], b2_ref[...])
    y = jnp.dot(c(oo), proj_ref[...], preferred_element_type=jnp.float32)
    out_ref[...] = y.reshape(Bb, Q, E)


def _pick_block_b(B, L):
    """Largest divisor of B that keeps >=2 grid steps (v7x: 2 TCs) and a
    bounded number of rows per step."""
    best = 1
    for d in range(1, B + 1):
        if B % d != 0:
            continue
        if d * L > 2048:
            continue
        if B >= 2 and B // d < 2:
            continue
        best = d
    return best


def resampler_forward_pallas(x, params, *, num_heads, tgt_size,
                             block_b=None, use_bf16=False):
    """x: (B, L, kv_dim) float32  ->  (B, num_queries, embed_dim) float32."""
    B, L, Dkv = x.shape
    Q, E = params["query"].shape
    assert L == tgt_size[0] * tgt_size[1]
    assert E % num_heads == 0
    hd = E // num_heads
    eps = 1e-6
    cdt = jnp.bfloat16 if use_bf16 else jnp.float32
    # NOTE: production sizes should keep E (and ideally hd) a multiple of 128
    # for lane-dense stores; the toy test below uses smaller shapes.

    if block_b is None:
        block_b = _pick_block_b(B, L)
    assert B % block_b == 0
    nb = B // block_b

    # ---- batch-independent query-side prep, hoisted out of the kernel ----
    q_raw = params["query"]
    mu = jnp.mean(q_raw, axis=-1, keepdims=True)
    var = jnp.mean((q_raw - mu) ** 2, axis=-1, keepdims=True)
    q_ln = (q_raw - mu) * lax.rsqrt(var + eps) * params["ln_q_g"] + params["ln_q_b"]
    q_in = q_ln + params["pos_embed"]                                # (Q, E)
    q_proj = q_in @ params["wq"] + params["bq"]                      # (Q, E)
    q_proj = q_proj * (1.0 / math.sqrt(hd))                          # fold attn scale
    q_heads = q_proj.reshape(Q, num_heads, hd).transpose(1, 0, 2).astype(cdt)

    pos_kv = get_abs_pos(params["pos_embed"], tgt_size).astype(jnp.float32)  # (L, E)

    def r2(a):  # (E,) vectors -> (1, E) f32 blocks
        return a.reshape(1, -1).astype(jnp.float32)

    xw = x.astype(cdt)
    args = (xw, q_heads, pos_kv, params["kv_w"].astype(cdt),
            r2(params["ln_kv_g"]), r2(params["ln_kv_b"]),
            params["wk"].astype(cdt), r2(params["bk"]),
            params["wv"].astype(cdt), r2(params["bv"]),
            params["wo"].astype(cdt), r2(params["bo"]),
            r2(params["ln_post_g"]), r2(params["ln_post_b"]),
            params["proj"].astype(cdt))

    def full_spec(a):  # whole-array block, constant index map (resident)
        nd = a.ndim
        return pl.BlockSpec(a.shape, lambda i, _nd=nd: (0,) * _nd)

    in_specs = [pl.BlockSpec((block_b, L, Dkv), lambda i: (i, 0, 0))] + \
               [full_spec(a) for a in args[1:]]

    # Cost estimate so XLA can overlap the query-prep / resize glue with the kernel.
    flops = 2 * B * (L * Dkv * E + 2 * L * E * E + 2 * Q * L * E + 2 * Q * E * E)
    transcendentals = B * num_heads * Q * L
    bytes_accessed = int(sum(int(np.prod(a.shape)) * a.dtype.itemsize for a in args)
                         + B * Q * E * 4)

    # Explicit VMEM budget (weights are resident + x/out blocks double-buffered).
    blk_bytes = int(sum(int(np.prod(a.shape)) * a.dtype.itemsize for a in args[1:]))
    blk_bytes += 2 * (block_b * L * Dkv * xw.dtype.itemsize + block_b * Q * E * 4)
    blk_bytes += block_b * Q * E * 4                                  # scratch slab
    vmem_limit = int(min(56 * 2 ** 20, max(32 * 2 ** 20, 2 * blk_bytes)))

    out = pl.pallas_call(
        partial(_resampler_kernel, eps=eps, compute_dtype=cdt,
                approx_recip=use_bf16),
        out_shape=jax.ShapeDtypeStruct((B, Q, E), jnp.float32),
        grid=(nb,),
        in_specs=in_specs,
        out_specs=pl.BlockSpec((block_b, Q, E), lambda i: (i, 0, 0)),
        scratch_shapes=[pltpu.VMEM((block_b * Q, E), jnp.float32)],
        compiler_params=pltpu.CompilerParams(
            dimension_semantics=("parallel",),
            vmem_limit_bytes=vmem_limit),
        cost_estimate=pl.CostEstimate(flops=flops,
                                      transcendentals=transcendentals,
                                      bytes_accessed=bytes_accessed),
    )(*args)
    return out


# ----------------------------------------------------------------------------
# Pure-JAX reference (same semantics as the PyTorch module forward)
# ----------------------------------------------------------------------------
def resampler_forward_ref(x, params, *, num_heads, tgt_size):
    eps = 1e-6

    def ln(t, g, b):
        mu = jnp.mean(t, axis=-1, keepdims=True)
        var = jnp.mean((t - mu) ** 2, axis=-1, keepdims=True)
        return (t - mu) / jnp.sqrt(var + eps) * g + b

    B, L, Dkv = x.shape
    E = params["query"].shape[1]
    hd = E // num_heads

    pos_kv = get_abs_pos(params["pos_embed"], tgt_size)              # (L, E)
    xk = x @ params["kv_w"]                                          # (B, L, E)
    xk = ln(xk, params["ln_kv_g"], params["ln_kv_b"])

    q = ln(params["query"], params["ln_q_g"], params["ln_q_b"]) + params["pos_embed"]
    q = q @ params["wq"] + params["bq"]                              # (Q, E)
    k = (xk + pos_kv[None]) @ params["wk"] + params["bk"]            # (B, L, E)
    v = xk @ params["wv"] + params["bv"]                             # (B, L, E)

    Qn = q.shape[0]
    qh = q.reshape(Qn, num_heads, hd).transpose(1, 0, 2)             # (H, Q, hd)
    kh = k.reshape(B, L, num_heads, hd).transpose(0, 2, 1, 3)        # (B, H, L, hd)
    vh = v.reshape(B, L, num_heads, hd).transpose(0, 2, 1, 3)
    s = jnp.einsum("hqd,bhkd->bhqk", qh, kh) / math.sqrt(hd)
    p = jax.nn.softmax(s, axis=-1)
    o = jnp.einsum("bhqk,bhkd->bhqd", p, vh)                         # (B, H, Q, hd)
    o = o.transpose(0, 2, 1, 3).reshape(B, Qn, E)
    o = o @ params["wo"] + params["bo"]
    o = ln(o, params["ln_post_g"], params["ln_post_b"])
    return o @ params["proj"]


# ----------------------------------------------------------------------------
# Deterministic synthetic parameter init
# ----------------------------------------------------------------------------
def make_params(key, grid_size, embed_dim, kv_dim):
    Q = grid_size ** 2
    ks = jax.random.split(key, 12)
    n = lambda k, shape, std=0.02: std * jax.random.normal(k, shape, jnp.float32)
    params = {
        "pos_embed": jnp.asarray(get_2d_sincos_pos_embed(embed_dim, grid_size),
                                 jnp.float32),                       # (Q, E) frozen
        "query": n(ks[0], (Q, embed_dim)),
        "kv_w": (n(ks[1], (kv_dim, embed_dim)) if kv_dim != embed_dim
                 else jnp.eye(embed_dim, dtype=jnp.float32)),
        "ln_q_g": jnp.ones((embed_dim,), jnp.float32),
        "ln_q_b": jnp.zeros((embed_dim,), jnp.float32),
        "ln_kv_g": jnp.ones((embed_dim,), jnp.float32),
        "ln_kv_b": jnp.zeros((embed_dim,), jnp.float32),
        "ln_post_g": jnp.ones((embed_dim,), jnp.float32),
        "ln_post_b": jnp.zeros((embed_dim,), jnp.float32),
        # MHA in_proj (stored pre-transposed for right-multiply) + biases
        "wq": n(ks[2], (embed_dim, embed_dim)),
        "wk": n(ks[3], (embed_dim, embed_dim)),
        "wv": n(ks[4], (embed_dim, embed_dim)),
        "bq": n(ks[5], (embed_dim,)),
        "bk": n(ks[6], (embed_dim,)),
        "bv": n(ks[7], (embed_dim,)),
        "wo": n(ks[8], (embed_dim, embed_dim)),
        "bo": n(ks[9], (embed_dim,)),
        "proj": embed_dim ** (-0.5) * jax.random.normal(ks[10],
                                                        (embed_dim, embed_dim),
                                                        jnp.float32),
    }
    return params


if __name__ == "__main__":
    # Small shapes: grid_size=4 -> 16 queries, embed_dim=32, 4 heads,
    # kv_dim=48 (exercises kv_proj), batch=4 (exercises batch fusion block_b=2,
    # keeping 2 grid steps), tgt_size=(4,4) -> L=16.
    grid_size, embed_dim, num_heads, kv_dim = 4, 32, 4, 48
    tgt_size = (4, 4)
    B = 4
    L = tgt_size[0] * tgt_size[1]

    key = jax.random.PRNGKey(0)
    kp, kx = jax.random.split(key)
    params = make_params(kp, grid_size, embed_dim, kv_dim)
    x = jax.random.normal(kx, (B, L, kv_dim), jnp.float32)

    ref = resampler_forward_ref(x, params, num_heads=num_heads, tgt_size=tgt_size)

    # TODO(synk): attn_mask is not supported in this kernel (forward default is None).
    # f32 path: tight check against the pure-JAX reference.
    out = resampler_forward_pallas(x, params, num_heads=num_heads, tgt_size=tgt_size)
    out = jax.block_until_ready(out)
    np.testing.assert_allclose(np.asarray(out), np.asarray(ref), rtol=1e-4, atol=1e-4)
    assert out.shape == (B, grid_size ** 2, embed_dim)

    # bf16 MXU perf mode: sanity check only (bf16 operands, f32 accumulation).
    out_bf16 = resampler_forward_pallas(x, params, num_heads=num_heads,
                                        tgt_size=tgt_size, use_bf16=True)
    out_bf16 = jax.block_until_ready(out_bf16)
    assert np.isfinite(np.asarray(out_bf16)).all()
    assert float(np.max(np.abs(np.asarray(out_bf16) - np.asarray(ref)))) < 0.25

    print("KERNEL_OK")
</pallas_src>

<mosaic_0001>
module attributes {stable_mosaic.version = 11 : i64} {
  func.func @_resampler_kernel(%arg0: i32, %arg1: memref<2x16x48xf32, #tpu.memory_space<vmem>>, %arg2: memref<4x16x8xf32, #tpu.memory_space<vmem>>, %arg3: memref<16x32xf32, #tpu.memory_space<vmem>>, %arg4: memref<48x32xf32, #tpu.memory_space<vmem>>, %arg5: memref<1x32xf32, #tpu.memory_space<vmem>>, %arg6: memref<1x32xf32, #tpu.memory_space<vmem>>, %arg7: memref<32x32xf32, #tpu.memory_space<vmem>>, %arg8: memref<1x32xf32, #tpu.memory_space<vmem>>, %arg9: memref<32x32xf32, #tpu.memory_space<vmem>>, %arg10: memref<1x32xf32, #tpu.memory_space<vmem>>, %arg11: memref<32x32xf32, #tpu.memory_space<vmem>>, %arg12: memref<1x32xf32, #tpu.memory_space<vmem>>, %arg13: memref<1x32xf32, #tpu.memory_space<vmem>>, %arg14: memref<1x32xf32, #tpu.memory_space<vmem>>, %arg15: memref<32x32xf32, #tpu.memory_space<vmem>>, %arg16: memref<2x16x32xf32, #tpu.memory_space<vmem>>, %arg17: memref<32x32xf32, #tpu.memory_space<vmem>>) attributes {dimension_semantics = [#tpu.dimension_semantics<parallel>], iteration_bounds = array<i64: 2>, scalar_prefetch = 0 : i64, scratch_operands = 1 : i64, tpu.core_type = #tpu.core_type<tc>, window_params = [{transform_indices = @transform_0, window_bounds = array<i64: 2, 16, 48>}, {pipeline_mode = #tpu.pipeline_mode<synchronous>, transform_indices = @transform_1, window_bounds = array<i64: 4, 16, 8>}, {pipeline_mode = #tpu.pipeline_mode<synchronous>, transform_indices = @transform_2, window_bounds = array<i64: 16, 32>}, {pipeline_mode = #tpu.pipeline_mode<synchronous>, transform_indices = @transform_3, window_bounds = array<i64: 48, 32>}, {pipeline_mode = #tpu.pipeline_mode<synchronous>, transform_indices = @transform_4, window_bounds = array<i64: 1, 32>}, {pipeline_mode = #tpu.pipeline_mode<synchronous>, transform_indices = @transform_5, window_bounds = array<i64: 1, 32>}, {pipeline_mode = #tpu.pipeline_mode<synchronous>, transform_indices = @transform_6, window_bounds = array<i64: 32, 32>}, {pipeline_mode = #tpu.pipeline_mode<synchronous>, transform_indices = @transform_7, window_bounds = array<i64: 1, 32>}, {pipeline_mode = #tpu.pipeline_mode<synchronous>, transform_indices = @transform_8, window_bounds = array<i64: 32, 32>}, {pipeline_mode = #tpu.pipeline_mode<synchronous>, transform_indices = @transform_9, window_bounds = array<i64: 1, 32>}, {pipeline_mode = #tpu.pipeline_mode<synchronous>, transform_indices = @transform_10, window_bounds = array<i64: 32, 32>}, {pipeline_mode = #tpu.pipeline_mode<synchronous>, transform_indices = @transform_11, window_bounds = array<i64: 1, 32>}, {pipeline_mode = #tpu.pipeline_mode<synchronous>, transform_indices = @transform_12, window_bounds = array<i64: 1, 32>}, {pipeline_mode = #tpu.pipeline_mode<synchronous>, transform_indices = @transform_13, window_bounds = array<i64: 1, 32>}, {pipeline_mode = #tpu.pipeline_mode<synchronous>, transform_indices = @transform_14, window_bounds = array<i64: 32, 32>}, {transform_indices = @transform_15, window_bounds = array<i64: 2, 16, 32>}]} {
    %c0 = arith.constant 0 : index
    %c0_0 = arith.constant 0 : index
    %c0_1 = arith.constant 0 : index
    %0 = vector.load %arg1[%c0, %c0_0, %c0_1] : memref<2x16x48xf32, #tpu.memory_space<vmem>>, vector<2x16x48xf32>
    %1 = vector.shape_cast %0 : vector<2x16x48xf32> to vector<32x48xf32>
    %c0_2 = arith.constant 0 : index
    %c0_3 = arith.constant 0 : index
    %2 = vector.load %arg4[%c0_2, %c0_3] : memref<48x32xf32, #tpu.memory_space<vmem>>, vector<48x32xf32>
    %cst = arith.constant dense<0.000000e+00> : vector<32x32xf32>
    %3 = tpu.matmul %1, %2, %cst {dimension_numbers = #tpu.dot_dimension_numbers<[1], [0], [0], [1], [0, 0, 1, 1], [], []>} : vector<32x48xf32>, vector<48x32xf32>, vector<32x32xf32> -> vector<32x32xf32>
    %c0_4 = arith.constant 0 : index
    %c0_5 = arith.constant 0 : index
    %4 = vector.load %arg5[%c0_4, %c0_5] : memref<1x32xf32, #tpu.memory_space<vmem>>, vector<1x32xf32>
    %c0_6 = arith.constant 0 : index
    %c0_7 = arith.constant 0 : index
    %5 = vector.load %arg6[%c0_6, %c0_7] : memref<1x32xf32, #tpu.memory_space<vmem>>, vector<1x32xf32>
    %cst_8 = arith.constant dense<0.000000e+00> : vector<32xf32>
    %6 = vector.multi_reduction <add>, %3, %cst_8 [1] : vector<32x32xf32> to vector<32xf32>
    %7 = vector.shape_cast %6 : vector<32xf32> to vector<32x1xf32>
    %cst_9 = arith.constant 3.200000e+01 : f32
    %8 = vector.broadcast %cst_9 : f32 to vector<32x1xf32>
    %9 = arith.divf %7, %8 : vector<32x1xf32>
    %10 = vector.broadcast %9 : vector<32x1xf32> to vector<32x32xf32>
    %11 = arith.subf %3, %10 : vector<32x32xf32>
    %12 = arith.mulf %11, %11 : vector<32x32xf32>
    %cst_10 = arith.constant dense<0.000000e+00> : vector<32xf32>
    %13 = vector.multi_reduction <add>, %12, %cst_10 [1] : vector<32x32xf32> to vector<32xf32>
    %14 = vector.shape_cast %13 : vector<32xf32> to vector<32x1xf32>
    %cst_11 = arith.constant 3.200000e+01 : f32
    %15 = vector.broadcast %cst_11 : f32 to vector<32x1xf32>
    %16 = arith.divf %14, %15 : vector<32x1xf32>
    %17 = vector.broadcast %9 : vector<32x1xf32> to vector<32x32xf32>
    %18 = arith.subf %3, %17 : vector<32x32xf32>
    %cst_12 = arith.constant 9.99999997E-7 : f32
    %19 = vector.broadcast %cst_12 : f32 to vector<32x1xf32>
    %20 = arith.addf %16, %19 : vector<32x1xf32>
    %21 = math.rsqrt %20 : vector<32x1xf32>
    %22 = vector.broadcast %21 : vector<32x1xf32> to vector<32x32xf32>
    %23 = arith.mulf %18, %22 : vector<32x32xf32>
    %24 = vector.broadcast %4 : vector<1x32xf32> to vector<32x32xf32>
    %25 = arith.mulf %23, %24 : vector<32x32xf32>
    %26 = vector.broadcast %5 : vector<1x32xf32> to vector<32x32xf32>
    %27 = arith.addf %25, %26 : vector<32x32xf32>
    %28 = vector.shape_cast %27 : vector<32x32xf32> to vector<2x16x32xf32>
    %c0_13 = arith.constant 0 : index
    %c0_14 = arith.constant 0 : index
    %29 = vector.load %arg3[%c0_13, %c0_14] : memref<16x32xf32, #tpu.memory_space<vmem>>, vector<16x32xf32>
    %30 = vector.shape_cast %29 : vector<16x32xf32> to vector<1x16x32xf32>
    %31 = vector.broadcast %30 : vector<1x16x32xf32> to vector<2x16x32xf32>
    %32 = arith.addf %28, %31 : vector<2x16x32xf32>
    %33 = vector.shape_cast %32 : vector<2x16x32xf32> to vector<32x32xf32>
    %c0_15 = arith.constant 0 : index
    %c0_16 = arith.constant 0 : index
    %34 = vector.load %arg7[%c0_15, %c0_16] : memref<32x32xf32, #tpu.memory_space<vmem>>, vector<32x32xf32>
    %cst_17 = arith.constant dense<0.000000e+00> : vector<32x32xf32>
    %35 = tpu.matmul %33, %34, %cst_17 {dimension_numbers = #tpu.dot_dimension_numbers<[1], [0], [0], [1], [0, 0, 1, 1], [], []>} : vector<32x32xf32>, vector<32x32xf32>, vector<32x32xf32> -> vector<32x32xf32>
    %c0_18 = arith.constant 0 : index
    %c0_19 = arith.constant 0 : index
    %36 = vector.load %arg8[%c0_18, %c0_19] : memref<1x32xf32, #tpu.memory_space<vmem>>, vector<1x32xf32>
    %37 = vector.broadcast %36 : vector<1x32xf32> to vector<32x32xf32>
    %38 = arith.addf %35, %37 : vector<32x32xf32>
    %c0_20 = arith.constant 0 : index
    %c0_21 = arith.constant 0 : index
    %39 = vector.load %arg9[%c0_20, %c0_21] : memref<32x32xf32, #tpu.memory_space<vmem>>, vector<32x32xf32>
    %cst_22 = arith.constant dense<0.000000e+00> : vector<32x32xf32>
    %40 = tpu.matmul %27, %39, %cst_22 {dimension_numbers = #tpu.dot_dimension_numbers<[1], [0], [0], [1], [0, 0, 1, 1], [], []>} : vector<32x32xf32>, vector<32x32xf32>, vector<32x32xf32> -> vector<32x32xf32>
    %c0_23 = arith.constant 0 : index
    %c0_24 = arith.constant 0 : index
    %41 = vector.load %arg10[%c0_23, %c0_24] : memref<1x32xf32, #tpu.memory_space<vmem>>, vector<1x32xf32>
    %42 = vector.broadcast %41 : vector<1x32xf32> to vector<32x32xf32>
    %43 = arith.addf %40, %42 : vector<32x32xf32>
    %c0_25 = arith.constant 0 : index
    %c0_26 = arith.constant 0 : index
    %c0_27 = arith.constant 0 : index
    %44 = vector.load %arg2[%c0_25, %c0_26, %c0_27] : memref<4x16x8xf32, #tpu.memory_space<vmem>>, vector<4x16x8xf32>
    %45 = vector.extract_strided_slice %38 {offsets = [0, 0], sizes = [16, 32], strides = [1, 1]} : vector<32x32xf32> to vector<16x32xf32>
    %46 = vector.extract_strided_slice %43 {offsets = [0, 0], sizes = [16, 32], strides = [1, 1]} : vector<32x32xf32> to vector<16x32xf32>
    %47 = vector.extract_strided_slice %44 {offsets = [0, 0, 0], sizes = [1, 16, 8], strides = [1, 1, 1]} : vector<4x16x8xf32> to vector<1x16x8xf32>
    %48 = vector.shape_cast %47 : vector<1x16x8xf32> to vector<16x8xf32>
    %49 = vector.extract_strided_slice %45 {offsets = [0, 0], sizes = [16, 8], strides = [1, 1]} : vector<16x32xf32> to vector<16x8xf32>
    %50 = vector.extract_strided_slice %46 {offsets = [0, 0], sizes = [16, 8], strides = [1, 1]} : vector<16x32xf32> to vector<16x8xf32>
    %cst_28 = arith.constant dense<0.000000e+00> : vector<16x16xf32>
    %51 = tpu.matmul %48, %49, %cst_28 {dimension_numbers = #tpu.dot_dimension_numbers<[1], [1], [0], [0], [0, 0, 1, 0], [], []>} : vector<16x8xf32>, vector<16x8xf32>, vector<16x16xf32> -> vector<16x16xf32>
    %cst_29 = arith.constant dense<0xFF800000> : vector<16xf32>
    %52 = vector.multi_reduction <maximumf>, %51, %cst_29 [1] : vector<16x16xf32> to vector<16xf32>
    %53 = vector.shape_cast %52 : vector<16xf32> to vector<16x1xf32>
    %54 = vector.broadcast %53 : vector<16x1xf32> to vector<16x16xf32>
    %55 = arith.subf %51, %54 : vector<16x16xf32>
    %56 = math.exp %55 : vector<16x16xf32>
    %cst_30 = arith.constant dense<0.000000e+00> : vector<16xf32>
    %57 = vector.multi_reduction <add>, %56, %cst_30 [1] : vector<16x16xf32> to vector<16xf32>
    %58 = vector.shape_cast %57 : vector<16xf32> to vector<16x1xf32>
    %cst_31 = arith.constant 1.000000e+00 : f32
    %59 = vector.broadcast %cst_31 : f32 to vector<16x1xf32>
    %60 = arith.divf %59, %58 : vector<16x1xf32>
    %61 = vector.broadcast %60 : vector<16x1xf32> to vector<16x16xf32>
    %62 = arith.mulf %56, %61 : vector<16x16xf32>
    %cst_32 = arith.constant dense<0.000000e+00> : vector<16x8xf32>
    %63 = tpu.matmul %62, %50, %cst_32 {dimension_numbers = #tpu.dot_dimension_numbers<[1], [0], [0], [1], [0, 0, 1, 1], [], []>} : vector<16x16xf32>, vector<16x8xf32>, vector<16x8xf32> -> vector<16x8xf32>
    %c0_33 = arith.constant 0 : index
    %c0_34 = arith.constant 0 : index
    %64 = vector.load %arg17[%c0_33, %c0_34] : memref<32x32xf32, #tpu.memory_space<vmem>>, vector<16x8xf32>
    tpu.vector_store %arg17[%c0_33, %c0_34], %63 {strides = array<i32>} : memref<32x32xf32, #tpu.memory_space<vmem>>, vector<16x8xf32>,
    %65 = vector.extract_strided_slice %44 {offsets = [1, 0, 0], sizes = [1, 16, 8], strides = [1, 1, 1]} : vector<4x16x8xf32> to vector<1x16x8xf32>
    %66 = vector.shape_cast %65 : vector<1x16x8xf32> to vector<16x8xf32>
    %67 = vector.extract_strided_slice %45 {offsets = [0, 8], sizes = [16, 8], strides = [1, 1]} : vector<16x32xf32> to vector<16x8xf32>
    %68 = vector.extract_strided_slice %46 {offsets = [0, 8], sizes = [16, 8], strides = [1, 1]} : vector<16x32xf32> to vector<16x8xf32>
    %cst_35 = arith.constant dense<0.000000e+00> : vector<16x16xf32>
    %69 = tpu.matmul %66, %67, %cst_35 {dimension_numbers = #tpu.dot_dimension_numbers<[1], [1], [0], [0], [0, 0, 1, 0], [], []>} : vector<16x8xf32>, vector<16x8xf32>, vector<16x16xf32> -> vector<16x16xf32>
    %cst_36 = arith.constant dense<0xFF800000> : vector<16xf32>
    %70 = vector.multi_reduction <maximumf>, %69, %cst_36 [1] : vector<16x16xf32> to vector<16xf32>
    %71 = vector.shape_cast %70 : vector<16xf32> to vector<16x1xf32>
    %72 = vector.broadcast %71 : vector<16x1xf32> to vector<16x16xf32>
    %73 = arith.subf %69, %72 : vector<16x16xf32>
    %74 = math.exp %73 : vector<16x16xf32>
    %cst_37 = arith.constant dense<0.000000e+00> : vector<16xf32>
    %75 = vector.multi_reduction <add>, %74, %cst_37 [1] : vector<16x16xf32> to vector<16xf32>
    %76 = vector.shape_cast %75 : vector<16xf32> to vector<16x1xf32>
    %cst_38 = arith.constant 1.000000e+00 : f32
    %77 = vector.broadcast %cst_38 : f32 to vector<16x1xf32>
    %78 = arith.divf %77, %76 : vector<16x1xf32>
    %79 = vector.broadcast %78 : vector<16x1xf32> to vector<16x16xf32>
    %80 = arith.mulf %74, %79 : vector<16x16xf32>
    %cst_39 = arith.constant dense<0.000000e+00> : vector<16x8xf32>
    %81 = tpu.matmul %80, %68, %cst_39 {dimension_numbers = #tpu.dot_dimension_numbers<[1], [0], [0], [1], [0, 0, 1, 1], [], []>} : vector<16x16xf32>, vector<16x8xf32>, vector<16x8xf32> -> vector<16x8xf32>
    %c0_40 = arith.constant 0 : index
    %c8 = arith.constant 8 : index
    %82 = vector.load %arg17[%c0_40, %c8] : memref<32x32xf32, #tpu.memory_space<vmem>>, vector<16x8xf32>
    tpu.vector_store %arg17[%c0_40, %c8], %81 {strides = array<i32>} : memref<32x32xf32, #tpu.memory_space<vmem>>, vector<16x8xf32>,
    %83 = vector.extract_strided_slice %44 {offsets = [2, 0, 0], sizes = [1, 16, 8], strides = [1, 1, 1]} : vector<4x16x8xf32> to vector<1x16x8xf32>
    %84 = vector.shape_cast %83 : vector<1x16x8xf32> to vector<16x8xf32>
    %85 = vector.extract_strided_slice %45 {offsets = [0, 16], sizes = [16, 8], strides = [1, 1]} : vector<16x32xf32> to vector<16x8xf32>
    %86 = vector.extract_strided_slice %46 {offsets = [0, 16], sizes = [16, 8], strides = [1, 1]} : vector<16x32xf32> to vector<16x8xf32>
    %cst_41 = arith.constant dense<0.000000e+00> : vector<16x16xf32>
    %87 = tpu.matmul %84, %85, %cst_41 {dimension_numbers = #tpu.dot_dimension_numbers<[1], [1], [0], [0], [0, 0, 1, 0], [], []>} : vector<16x8xf32>, vector<16x8xf32>, vector<16x16xf32> -> vector<16x16xf32>
    %cst_42 = arith.constant dense<0xFF800000> : vector<16xf32>
    %88 = vector.multi_reduction <maximumf>, %87, %cst_42 [1] : vector<16x16xf32> to vector<16xf32>
    %89 = vector.shape_cast %88 : vector<16xf32> to vector<16x1xf32>
    %90 = vector.broadcast %89 : vector<16x1xf32> to vector<16x16xf32>
    %91 = arith.subf %87, %90 : vector<16x16xf32>
    %92 = math.exp %91 : vector<16x16xf32>
    %cst_43 = arith.constant dense<0.000000e+00> : vector<16xf32>
    %93 = vector.multi_reduction <add>, %92, %cst_43 [1] : vector<16x16xf32> to vector<16xf32>
    %94 = vector.shape_cast %93 : vector<16xf32> to vector<16x1xf32>
    %cst_44 = arith.constant 1.000000e+00 : f32
    %95 = vector.broadcast %cst_44 : f32 to vector<16x1xf32>
    %96 = arith.divf %95, %94 : vector<16x1xf32>
    %97 = vector.broadcast %96 : vector<16x1xf32> to vector<16x16xf32>
    %98 = arith.mulf %92, %97 : vector<16x16xf32>
    %cst_45 = arith.constant dense<0.000000e+00> : vector<16x8xf32>
    %99 = tpu.matmul %98, %86, %cst_45 {dimension_numbers = #tpu.dot_dimension_numbers<[1], [0], [0], [1], [0, 0, 1, 1], [], []>} : vector<16x16xf32>, vector<16x8xf32>, vector<16x8xf32> -> vector<16x8xf32>
    %c0_46 = arith.constant 0 : index
    %c16 = arith.constant 16 : index
    %100 = vector.load %arg17[%c0_46, %c16] : memref<32x32xf32, #tpu.memory_space<vmem>>, vector<16x8xf32>
    tpu.vector_store %arg17[%c0_46, %c16], %99 {strides = array<i32>} : memref<32x32xf32, #tpu.memory_space<vmem>>, vector<16x8xf32>,
    %101 = vector.extract_strided_slice %44 {offsets = [3, 0, 0], sizes = [1, 16, 8], strides = [1, 1, 1]} : vector<4x16x8xf32> to vector<1x16x8xf32>
    %102 = vector.shape_cast %101 : vector<1x16x8xf32> to vector<16x8xf32>
    %103 = vector.extract_strided_slice %45 {offsets = [0, 24], sizes = [16, 8], strides = [1, 1]} : vector<16x32xf32> to vector<16x8xf32>
    %104 = vector.extract_strided_slice %46 {offsets = [0, 24], sizes = [16, 8], strides = [1, 1]} : vector<16x32xf32> to vector<16x8xf32>
    %cst_47 = arith.constant dense<0.000000e+00> : vector<16x16xf32>
    %105 = tpu.matmul %102, %103, %cst_47 {dimension_numbers = #tpu.dot_dimension_numbers<[1], [1], [0], [0], [0, 0, 1, 0], [], []>} : vector<16x8xf32>, vector<16x8xf32>, vector<16x16xf32> -> vector<16x16xf32>
    %cst_48 = arith.constant dense<0xFF800000> : vector<16xf32>
    %106 = vector.multi_reduction <maximumf>, %105, %cst_48 [1] : vector<16x16xf32> to vector<16xf32>
    %107 = vector.shape_cast %106 : vector<16xf32> to vector<16x1xf32>
    %108 = vector.broadcast %107 : vector<16x1xf32> to vector<16x16xf32>
    %109 = arith.subf %105, %108 : vector<16x16xf32>
    %110 = math.exp %109 : vector<16x16xf32>
    %cst_49 = arith.constant dense<0.000000e+00> : vector<16xf32>
    %111 = vector.multi_reduction <add>, %110, %cst_49 [1] : vector<16x16xf32> to vector<16xf32>
    %112 = vector.shape_cast %111 : vector<16xf32> to vector<16x1xf32>
    %cst_50 = arith.constant 1.000000e+00 : f32
    %113 = vector.broadcast %cst_50 : f32 to vector<16x1xf32>
    %114 = arith.divf %113, %112 : vector<16x1xf32>
    %115 = vector.broadcast %114 : vector<16x1xf32> to vector<16x16xf32>
    %116 = arith.mulf %110, %115 : vector<16x16xf32>
    %cst_51 = arith.constant dense<0.000000e+00> : vector<16x8xf32>
    %117 = tpu.matmul %116, %104, %cst_51 {dimension_numbers = #tpu.dot_dimension_numbers<[1], [0], [0], [1], [0, 0, 1, 1], [], []>} : vector<16x16xf32>, vector<16x8xf32>, vector<16x8xf32> -> vector<16x8xf32>
    %c0_52 = arith.constant 0 : index
    %c24 = arith.constant 24 : index
    %118 = vector.load %arg17[%c0_52, %c24] : memref<32x32xf32, #tpu.memory_space<vmem>>, vector<16x8xf32>
    tpu.vector_store %arg17[%c0_52, %c24], %117 {strides = array<i32>} : memref<32x32xf32, #tpu.memory_space<vmem>>, vector<16x8xf32>,
    %119 = vector.extract_strided_slice %38 {offsets = [16, 0], sizes = [16, 32], strides = [1, 1]} : vector<32x32xf32> to vector<16x32xf32>
    %120 = vector.extract_strided_slice %43 {offsets = [16, 0], sizes = [16, 32], strides = [1, 1]} : vector<32x32xf32> to vector<16x32xf32>
    %121 = vector.extract_strided_slice %44 {offsets = [0, 0, 0], sizes = [1, 16, 8], strides = [1, 1, 1]} : vector<4x16x8xf32> to vector<1x16x8xf32>
    %122 = vector.shape_cast %121 : vector<1x16x8xf32> to vector<16x8xf32>
    %123 = vector.extract_strided_slice %119 {offsets = [0, 0], sizes = [16, 8], strides = [1, 1]} : vector<16x32xf32> to vector<16x8xf32>
    %124 = vector.extract_strided_slice %120 {offsets = [0, 0], sizes = [16, 8], strides = [1, 1]} : vector<16x32xf32> to vector<16x8xf32>
    %cst_53 = arith.constant dense<0.000000e+00> : vector<16x16xf32>
    %125 = tpu.matmul %122, %123, %cst_53 {dimension_numbers = #tpu.dot_dimension_numbers<[1], [1], [0], [0], [0, 0, 1, 0], [], []>} : vector<16x8xf32>, vector<16x8xf32>, vector<16x16xf32> -> vector<16x16xf32>
    %cst_54 = arith.constant dense<0xFF800000> : vector<16xf32>
    %126 = vector.multi_reduction <maximumf>, %125, %cst_54 [1] : vector<16x16xf32> to vector<16xf32>
    %127 = vector.shape_cast %126 : vector<16xf32> to vector<16x1xf32>
    %128 = vector.broadcast %127 : vector<16x1xf32> to vector<16x16xf32>
    %129 = arith.subf %125, %128 : vector<16x16xf32>
    %130 = math.exp %129 : vector<16x16xf32>
    %cst_55 = arith.constant dense<0.000000e+00> : vector<16xf32>
    %131 = vector.multi_reduction <add>, %130, %cst_55 [1] : vector<16x16xf32> to vector<16xf32>
    %132 = vector.shape_cast %131 : vector<16xf32> to vector<16x1xf32>
    %cst_56 = arith.constant 1.000000e+00 : f32
    %133 = vector.broadcast %cst_56 : f32 to vector<16x1xf32>
    %134 = arith.divf %133, %132 : vector<16x1xf32>
    %135 = vector.broadcast %134 : vector<16x1xf32> to vector<16x16xf32>
    %136 = arith.mulf %130, %135 : vector<16x16xf32>
    %cst_57 = arith.constant dense<0.000000e+00> : vector<16x8xf32>
    %137 = tpu.matmul %136, %124, %cst_57 {dimension_numbers = #tpu.dot_dimension_numbers<[1], [0], [0], [1], [0, 0, 1, 1], [], []>} : vector<16x16xf32>, vector<16x8xf32>, vector<16x8xf32> -> vector<16x8xf32>
    %c16_58 = arith.constant 16 : index
    %c0_59 = arith.constant 0 : index
    %138 = vector.load %arg17[%c16_58, %c0_59] : memref<32x32xf32, #tpu.memory_space<vmem>>, vector<16x8xf32>
    tpu.vector_store %arg17[%c16_58, %c0_59], %137 {strides = array<i32>} : memref<32x32xf32, #tpu.memory_space<vmem>>, vector<16x8xf32>,
    %139 = vector.extract_strided_slice %44 {offsets = [1, 0, 0], sizes = [1, 16, 8], strides = [1, 1, 1]} : vector<4x16x8xf32> to vector<1x16x8xf32>
    %140 = vector.shape_cast %139 : vector<1x16x8xf32> to vector<16x8xf32>
    %141 = vector.extract_strided_slice %119 {offsets = [0, 8], sizes = [16, 8], strides = [1, 1]} : vector<16x32xf32> to vector<16x8xf32>
    %142 = vector.extract_strided_slice %120 {offsets = [0, 8], sizes = [16, 8], strides = [1, 1]} : vector<16x32xf32> to vector<16x8xf32>
    %cst_60 = arith.constant dense<0.000000e+00> : vector<16x16xf32>
    %143 = tpu.matmul %140, %141, %cst_60 {dimension_numbers = #tpu.dot_dimension_numbers<[1], [1], [0], [0], [0, 0, 1, 0], [], []>} : vector<16x8xf32>, vector<16x8xf32>, vector<16x16xf32> -> vector<16x16xf32>
    %cst_61 = arith.constant dense<0xFF800000> : vector<16xf32>
    %144 = vector.multi_reduction <maximumf>, %143, %cst_61 [1] : vector<16x16xf32> to vector<16xf32>
    %145 = vector.shape_cast %144 : vector<16xf32> to vector<16x1xf32>
    %146 = vector.broadcast %145 : vector<16x1xf32> to vector<16x16xf32>
    %147 = arith.subf %143, %146 : vector<16x16xf32>
    %148 = math.exp %147 : vector<16x16xf32>
    %cst_62 = arith.constant dense<0.000000e+00> : vector<16xf32>
    %149 = vector.multi_reduction <add>, %148, %cst_62 [1] : vector<16x16xf32> to vector<16xf32>
    %150 = vector.shape_cast %149 : vector<16xf32> to vector<16x1xf32>
    %cst_63 = arith.constant 1.000000e+00 : f32
    %151 = vector.broadcast %cst_63 : f32 to vector<16x1xf32>
    %152 = arith.divf %151, %150 : vector<16x1xf32>
    %153 = vector.broadcast %152 : vector<16x1xf32> to vector<16x16xf32>
    %154 = arith.mulf %148, %153 : vector<16x16xf32>
    %cst_64 = arith.constant dense<0.000000e+00> : vector<16x8xf32>
    %155 = tpu.matmul %154, %142, %cst_64 {dimension_numbers = #tpu.dot_dimension_numbers<[1], [0], [0], [1], [0, 0, 1, 1], [], []>} : vector<16x16xf32>, vector<16x8xf32>, vector<16x8xf32> -> vector<16x8xf32>
    %c16_65 = arith.constant 16 : index
    %c8_66 = arith.constant 8 : index
    %156 = vector.load %arg17[%c16_65, %c8_66] : memref<32x32xf32, #tpu.memory_space<vmem>>, vector<16x8xf32>
    tpu.vector_store %arg17[%c16_65, %c8_66], %155 {strides = array<i32>} : memref<32x32xf32, #tpu.memory_space<vmem>>, vector<16x8xf32>,
    %157 = vector.extract_strided_slice %44 {offsets = [2, 0, 0], sizes = [1, 16, 8], strides = [1, 1, 1]} : vector<4x16x8xf32> to vector<1x16x8xf32>
    %158 = vector.shape_cast %157 : vector<1x16x8xf32> to vector<16x8xf32>
    %159 = vector.extract_strided_slice %119 {offsets = [0, 16], sizes = [16, 8], strides = [1, 1]} : vector<16x32xf32> to vector<16x8xf32>
    %160 = vector.extract_strided_slice %120 {offsets = [0, 16], sizes = [16, 8], strides = [1, 1]} : vector<16x32xf32> to vector<16x8xf32>
    %cst_67 = arith.constant dense<0.000000e+00> : vector<16x16xf32>
    %161 = tpu.matmul %158, %159, %cst_67 {dimension_numbers = #tpu.dot_dimension_numbers<[1], [1], [0], [0], [0, 0, 1, 0], [], []>} : vector<16x8xf32>, vector<16x8xf32>, vector<16x16xf32> -> vector<16x16xf32>
    %cst_68 = arith.constant dense<0xFF800000> : vector<16xf32>
    %162 = vector.multi_reduction <maximumf>, %161, %cst_68 [1] : vector<16x16xf32> to vector<16xf32>
    %163 = vector.shape_cast %162 : vector<16xf32> to vector<16x1xf32>
    %164 = vector.broadcast %163 : vector<16x1xf32> to vector<16x16xf32>
    %165 = arith.subf %161, %164 : vector<16x16xf32>
    %166 = math.exp %165 : vector<16x16xf32>
    %cst_69 = arith.constant dense<0.000000e+00> : vector<16xf32>
    %167 = vector.multi_reduction <add>, %166, %cst_69 [1] : vector<16x16xf32> to vector<16xf32>
    %168 = vector.shape_cast %167 : vector<16xf32> to vector<16x1xf32>
    %cst_70 = arith.constant 1.000000e+00 : f32
    %169 = vector.broadcast %cst_70 : f32 to vector<16x1xf32>
    %170 = arith.divf %169, %168 : vector<16x1xf32>
    %171 = vector.broadcast %170 : vector<16x1xf32> to vector<16x16xf32>
    %172 = arith.mulf %166, %171 : vector<16x16xf32>
    %cst_71 = arith.constant dense<0.000000e+00> : vector<16x8xf32>
    %173 = tpu.matmul %172, %160, %cst_71 {dimension_numbers = #tpu.dot_dimension_numbers<[1], [0], [0], [1], [0, 0, 1, 1], [], []>} : vector<16x16xf32>, vector<16x8xf32>, vector<16x8xf32> -> vector<16x8xf32>
    %c16_72 = arith.constant 16 : index
    %c16_73 = arith.constant 16 : index
    %174 = vector.load %arg17[%c16_72, %c16_73] : memref<32x32xf32, #tpu.memory_space<vmem>>, vector<16x8xf32>
    tpu.vector_store %arg17[%c16_72, %c16_73], %173 {strides = array<i32>} : memref<32x32xf32, #tpu.memory_space<vmem>>, vector<16x8xf32>,
    %175 = vector.extract_strided_slice %44 {offsets = [3, 0, 0], sizes = [1, 16, 8], strides = [1, 1, 1]} : vector<4x16x8xf32> to vector<1x16x8xf32>
    %176 = vector.shape_cast %175 : vector<1x16x8xf32> to vector<16x8xf32>
    %177 = vector.extract_strided_slice %119 {offsets = [0, 24], sizes = [16, 8], strides = [1, 1]} : vector<16x32xf32> to vector<16x8xf32>
    %178 = vector.extract_strided_slice %120 {offsets = [0, 24], sizes = [16, 8], strides = [1, 1]} : vector<16x32xf32> to vector<16x8xf32>
    %cst_74 = arith.constant dense<0.000000e+00> : vector<16x16xf32>
    %179 = tpu.matmul %176, %177, %cst_74 {dimension_numbers = #tpu.dot_dimension_numbers<[1], [1], [0], [0], [0, 0, 1, 0], [], []>} : vector<16x8xf32>, vector<16x8xf32>, vector<16x16xf32> -> vector<16x16xf32>
    %cst_75 = arith.constant dense<0xFF800000> : vector<16xf32>
    %180 = vector.multi_reduction <maximumf>, %179, %cst_75 [1] : vector<16x16xf32> to vector<16xf32>
    %181 = vector.shape_cast %180 : vector<16xf32> to vector<16x1xf32>
    %182 = vector.broadcast %181 : vector<16x1xf32> to vector<16x16xf32>
    %183 = arith.subf %179, %182 : vector<16x16xf32>
    %184 = math.exp %183 : vector<16x16xf32>
    %cst_76 = arith.constant dense<0.000000e+00> : vector<16xf32>
    %185 = vector.multi_reduction <add>, %184, %cst_76 [1] : vector<16x16xf32> to vector<16xf32>
    %186 = vector.shape_cast %185 : vector<16xf32> to vector<16x1xf32>
    %cst_77 = arith.constant 1.000000e+00 : f32
    %187 = vector.broadcast %cst_77 : f32 to vector<16x1xf32>
    %188 = arith.divf %187, %186 : vector<16x1xf32>
    %189 = vector.broadcast %188 : vector<16x1xf32> to vector<16x16xf32>
    %190 = arith.mulf %184, %189 : vector<16x16xf32>
    %cst_78 = arith.constant dense<0.000000e+00> : vector<16x8xf32>
    %191 = tpu.matmul %190, %178, %cst_78 {dimension_numbers = #tpu.dot_dimension_numbers<[1], [0], [0], [1], [0, 0, 1, 1], [], []>} : vector<16x16xf32>, vector<16x8xf32>, vector<16x8xf32> -> vector<16x8xf32>
    %c16_79 = arith.constant 16 : index
    %c24_80 = arith.constant 24 : index
    %192 = vector.load %arg17[%c16_79, %c24_80] : memref<32x32xf32, #tpu.memory_space<vmem>>, vector<16x8xf32>
    tpu.vector_store %arg17[%c16_79, %c24_80], %191 {strides = array<i32>} : memref<32x32xf32, #tpu.memory_space<vmem>>, vector<16x8xf32>,
    %c0_81 = arith.constant 0 : index
    %c0_82 = arith.constant 0 : index
    %193 = vector.load %arg17[%c0_81, %c0_82] : memref<32x32xf32, #tpu.memory_space<vmem>>, vector<32x32xf32>
    %c0_83 = arith.constant 0 : index
    %c0_84 = arith.constant 0 : index
    %194 = vector.load %arg11[%c0_83, %c0_84] : memref<32x32xf32, #tpu.memory_space<vmem>>, vector<32x32xf32>
    %cst_85 = arith.constant dense<0.000000e+00> : vector<32x32xf32>
    %195 = tpu.matmul %193, %194, %cst_85 {dimension_numbers = #tpu.dot_dimension_numbers<[1], [0], [0], [1], [0, 0, 1, 1], [], []>} : vector<32x32xf32>, vector<32x32xf32>, vector<32x32xf32> -> vector<32x32xf32>
    %c0_86 = arith.constant 0 : index
    %c0_87 = arith.constant 0 : index
    %196 = vector.load %arg12[%c0_86, %c0_87] : memref<1x32xf32, #tpu.memory_space<vmem>>, vector<1x32xf32>
    %197 = vector.broadcast %196 : vector<1x32xf32> to vector<32x32xf32>
    %198 = arith.addf %195, %197 : vector<32x32xf32>
    %c0_88 = arith.constant 0 : index
    %c0_89 = arith.constant 0 : index
    %199 = vector.load %arg13[%c0_88, %c0_89] : memref<1x32xf32, #tpu.memory_space<vmem>>, vector<1x32xf32>
    %c0_90 = arith.constant 0 : index
    %c0_91 = arith.constant 0 : index
    %200 = vector.load %arg14[%c0_90, %c0_91] : memref<1x32xf32, #tpu.memory_space<vmem>>, vector<1x32xf32>
    %cst_92 = arith.constant dense<0.000000e+00> : vector<32xf32>
    %201 = vector.multi_reduction <add>, %198, %cst_92 [1] : vector<32x32xf32> to vector<32xf32>
    %202 = vector.shape_cast %201 : vector<32xf32> to vector<32x1xf32>
    %cst_93 = arith.constant 3.200000e+01 : f32
    %203 = vector.broadcast %cst_93 : f32 to vector<32x1xf32>
    %204 = arith.divf %202, %203 : vector<32x1xf32>
    %205 = vector.broadcast %204 : vector<32x1xf32> to vector<32x32xf32>
    %206 = arith.subf %198, %205 : vector<32x32xf32>
    %207 = arith.mulf %206, %206 : vector<32x32xf32>
    %cst_94 = arith.constant dense<0.000000e+00> : vector<32xf32>
    %208 = vector.multi_reduction <add>, %207, %cst_94 [1] : vector<32x32xf32> to vector<32xf32>
    %209 = vector.shape_cast %208 : vector<32xf32> to vector<32x1xf32>
    %cst_95 = arith.constant 3.200000e+01 : f32
    %210 = vector.broadcast %cst_95 : f32 to vector<32x1xf32>
    %211 = arith.divf %209, %210 : vector<32x1xf32>
    %212 = vector.broadcast %204 : vector<32x1xf32> to vector<32x32xf32>
    %213 = arith.subf %198, %212 : vector<32x32xf32>
    %cst_96 = arith.constant 9.99999997E-7 : f32
    %214 = vector.broadcast %cst_96 : f32 to vector<32x1xf32>
    %215 = arith.addf %211, %214 : vector<32x1xf32>
    %216 = math.rsqrt %215 : vector<32x1xf32>
    %217 = vector.broadcast %216 : vector<32x1xf32> to vector<32x32xf32>
    %218 = arith.mulf %213, %217 : vector<32x32xf32>
    %219 = vector.broadcast %199 : vector<1x32xf32> to vector<32x32xf32>
    %220 = arith.mulf %218, %219 : vector<32x32xf32>
    %221 = vector.broadcast %200 : vector<1x32xf32> to vector<32x32xf32>
    %222 = arith.addf %220, %221 : vector<32x32xf32>
    %c0_97 = arith.constant 0 : index
    %c0_98 = arith.constant 0 : index
    %223 = vector.load %arg15[%c0_97, %c0_98] : memref<32x32xf32, #tpu.memory_space<vmem>>, vector<32x32xf32>
    %cst_99 = arith.constant dense<0.000000e+00> : vector<32x32xf32>
    %224 = tpu.matmul %222, %223, %cst_99 {dimension_numbers = #tpu.dot_dimension_numbers<[1], [0], [0], [1], [0, 0, 1, 1], [], []>} : vector<32x32xf32>, vector<32x32xf32>, vector<32x32xf32> -> vector<32x32xf32>
    %225 = vector.shape_cast %224 : vector<32x32xf32> to vector<2x16x32xf32>
    %c0_100 = arith.constant 0 : index
    %c0_101 = arith.constant 0 : index
    %c0_102 = arith.constant 0 : index
    %226 = vector.load %arg16[%c0_100, %c0_101, %c0_102] : memref<2x16x32xf32, #tpu.memory_space<vmem>>, vector<2x16x32xf32>
    tpu.vector_store %arg16[%c0_100, %c0_101, %c0_102], %225 {strides = array<i32>} : memref<2x16x32xf32, #tpu.memory_space<vmem>>, vector<2x16x32xf32>,
    return
  }
  func.func @transform_0(%arg0: i32) -> (i32, i32, i32) {
    %c0_i32 = arith.constant 0 : i32
    %c0_i32_0 = arith.constant 0 : i32
    %c0_i32_1 = arith.constant 0 : i32
    return %arg0, %c0_i32, %c0_i32_0 : i32, i32, i32
  }
  func.func @transform_1(%arg0: i32) -> (i32, i32, i32) {
    %c0_i32 = arith.constant 0 : i32
    %c0_i32_0 = arith.constant 0 : i32
    %c0_i32_1 = arith.constant 0 : i32
    %c0_i32_2 = arith.constant 0 : i32
    return %c0_i32, %c0_i32_0, %c0_i32_1 : i32, i32, i32
  }
  func.func @transform_2(%arg0: i32) -> (i32, i32) {
    %c0_i32 = arith.constant 0 : i32
    %c0_i32_0 = arith.constant 0 : i32
    %c0_i32_1 = arith.constant 0 : i32
    return %c0_i32, %c0_i32_0 : i32, i32
  }
  func.func @transform_3(%arg0: i32) -> (i32, i32) {
    %c0_i32 = arith.constant 0 : i32
    %c0_i32_0 = arith.constant 0 : i32
    %c0_i32_1 = arith.constant 0 : i32
    return %c0_i32, %c0_i32_0 : i32, i32
  }
  func.func @transform_4(%arg0: i32) -> (i32, i32) {
    %c0_i32 = arith.constant 0 : i32
    %c0_i32_0 = arith.constant 0 : i32
    %c0_i32_1 = arith.constant 0 : i32
    return %c0_i32, %c0_i32_0 : i32, i32
  }
  func.func @transform_5(%arg0: i32) -> (i32, i32) {
    %c0_i32 = arith.constant 0 : i32
    %c0_i32_0 = arith.constant 0 : i32
    %c0_i32_1 = arith.constant 0 : i32
    return %c0_i32, %c0_i32_0 : i32, i32
  }
  func.func @transform_6(%arg0: i32) -> (i32, i32) {
    %c0_i32 = arith.constant 0 : i32
    %c0_i32_0 = arith.constant 0 : i32
    %c0_i32_1 = arith.constant 0 : i32
    return %c0_i32, %c0_i32_0 : i32, i32
  }
  func.func @transform_7(%arg0: i32) -> (i32, i32) {
    %c0_i32 = arith.constant 0 : i32
    %c0_i32_0 = arith.constant 0 : i32
    %c0_i32_1 = arith.constant 0 : i32
    return %c0_i32, %c0_i32_0 : i32, i32
  }
  func.func @transform_8(%arg0: i32) -> (i32, i32) {
    %c0_i32 = arith.constant 0 : i32
    %c0_i32_0 = arith.constant 0 : i32
    %c0_i32_1 = arith.constant 0 : i32
    return %c0_i32, %c0_i32_0 : i32, i32
  }
  func.func @transform_9(%arg0: i32) -> (i32, i32) {
    %c0_i32 = arith.constant 0 : i32
    %c0_i32_0 = arith.constant 0 : i32
    %c0_i32_1 = arith.constant 0 : i32
    return %c0_i32, %c0_i32_0 : i32, i32
  }
  func.func @transform_10(%arg0: i32) -> (i32, i32) {
    %c0_i32 = arith.constant 0 : i32
    %c0_i32_0 = arith.constant 0 : i32
    %c0_i32_1 = arith.constant 0 : i32
    return %c0_i32, %c0_i32_0 : i32, i32
  }
  func.func @transform_11(%arg0: i32) -> (i32, i32) {
    %c0_i32 = arith.constant 0 : i32
    %c0_i32_0 = arith.constant 0 : i32
    %c0_i32_1 = arith.constant 0 : i32
    return %c0_i32, %c0_i32_0 : i32, i32
  }
  func.func @transform_12(%arg0: i32) -> (i32, i32) {
    %c0_i32 = arith.constant 0 : i32
    %c0_i32_0 = arith.constant 0 : i32
    %c0_i32_1 = arith.constant 0 : i32
    return %c0_i32, %c0_i32_0 : i32, i32
  }
  func.func @transform_13(%arg0: i32) -> (i32, i32) {
    %c0_i32 = arith.constant 0 : i32
    %c0_i32_0 = arith.constant 0 : i32
    %c0_i32_1 = arith.constant 0 : i32
    return %c0_i32, %c0_i32_0 : i32, i32
  }
  func.func @transform_14(%arg0: i32) -> (i32, i32) {
    %c0_i32 = arith.constant 0 : i32
    %c0_i32_0 = arith.constant 0 : i32
    %c0_i32_1 = arith.constant 0 : i32
    return %c0_i32, %c0_i32_0 : i32, i32
  }
  func.func @transform_15(%arg0: i32) -> (i32, i32, i32) {
    %c0_i32 = arith.constant 0 : i32
    %c0_i32_0 = arith.constant 0 : i32
    %c0_i32_1 = arith.constant 0 : i32
    return %arg0, %c0_i32, %c0_i32_0 : i32, i32, i32
  }
}

</mosaic_0001>

<bundles_post_ra>
// kernel: tpu_custom_call.1
= control target key start
LH: loop header
LB: loop body
LE: loop exit
PB: predicated region body
PF: predicated region fallthrough
CT: control target
= control target key end

     0   :  { %s4434_s0 = inlined_call_operand.vmem [shape: f32[4,16,48], index: 0, kind: input, shape index: {}]   ;;  %s4435_s1 = inlined_call_operand.vmem [shape: f32[4,16,8], index: 1, kind: input, shape index: {}]   ;;  %s4436_s2 = inlined_call_operand.hbm [shape: f32[16,32], index: 2, kind: input, shape index: {}]   ;;  %s4437_s3 = inlined_call_operand.vmem [shape: f32[48,32], index: 3, kind: input, shape index: {}]   ;;  %s4438_s4 = inlined_call_operand.vmem [shape: f32[1,32], index: 4, kind: input, shape index: {}]   ;;  %s4439_s5 = inlined_call_operand.vmem [shape: f32[1,32], index: 5, kind: input, shape index: {}]   ;;  %s4440_s6 = inlined_call_operand.vmem [shape: f32[32,32], index: 6, kind: input, shape index: {}]   ;;  %s4441_s7 = inlined_call_operand.hbm [shape: f32[1,32], index: 7, kind: input, shape index: {}]   ;;  %s4442_s8 = inlined_call_operand.vmem [shape: f32[32,32], index: 8, kind: input, shape index: {}]   ;;  %s4443_s9 = inlined_call_operand.hbm [shape: f32[1,32], index: 9, kind: input, shape index: {}]   ;;  %s4444_s10 = inlined_call_operand.vmem [shape: f32[32,32], index: 10, kind: input, shape index: {}]   ;;  %s4445_s11 = inlined_call_operand.hbm [shape: f32[1,32], index: 11, kind: input, shape index: {}]   ;;  %s4446_s12 = inlined_call_operand.vmem [shape: f32[1,32], index: 12, kind: input, shape index: {}]   ;;  %s4447_s13 = inlined_call_operand.vmem [shape: f32[1,32], index: 13, kind: input, shape index: {}]   ;;  %s4448_s14 = inlined_call_operand.vmem [shape: f32[32,32], index: 14, kind: input, shape index: {}]   ;;  %s4449_s15 = inlined_call_operand.hbm [shape: f32[4,16,32], index: 15, kind: output, shape index: {}]  }
   0x1   :  { %4455 = sst [smem:[#allocation21_spill]] %s4441_s7 }
   0x2   :  { %20 = vsyncpa [#allocation4], 0 }
   0x3   :  { %21 = vsyncpa [#allocation7], 0 }
   0x4   :  { %22 = vsyncpa [#allocation10], 0 }
   0x5   :  { %23 = vsyncpa [#allocation5], 0 }
   0x6   :  { %25 = vsyncpa [#allocation5 + $0x1], 0  ;;  %s3841_s18 = smov 0   ;;  %s3843_s19 = smov 0  }
   0x7   :  { %s3845_s20 = smov 0   ;;  %s3847_s21 = smov 0  }
   0x8 LB: > { %4456 = sst [smem:[#allocation16_spill]] %s3733_s18  ;;  %s3862_s22 = sadd.s32 4294967295, %s3745_s21   ;;  %s3745_s21 = sphi %s3847_s21, %s4468_s21   ;;  %s3741_s20 = sphi %s3845_s20, %s4470_s20   ;;  %s3737_s19 = sphi %s3843_s19, %s4472_s19   ;;  %s3733_s18 = sphi %s3841_s18, %s4471_s18  }
   0x9   : > { %4457 = sst [smem:[#allocation17_spill]] %s3741_s20  ;;  %s3008_s23 = sadd.s32 4294967294, %s3745_s21  }
   0xa   : > { %s3866_s24 = sadd.s32 1, %s3745_s21   ;;  %s358_s25 = sadd.s32 1, %s3741_s20 }
   0xb   : > { %4458 = sst [smem:[#allocation18_spill]] %s3866_s24  ;;  %s355_s26 = ssub.s32 %s3745_s21, %s3866_s24 }
   0xc   : > { %p368_p0 = scmp.ne.s32.totalorder %s3741_s20, %s3737_s19  ;;  %p356_p1 = scmp.eq.s32.totalorder %s355_s26, 0 }
   0xd   : > { %p369_p2 = scmp.eq.s32.totalorder %s3862_s22, 1  ;;  %p374_p3 = scmp.ne.s32.totalorder %s3737_s19, %s3733_s18 }
   0xe   : > { %p375_p4 = scmp.eq.s32.totalorder %s3008_s23, 1  ;;  %p3009_p7 = scmp.ge.s32.totalorder %s3745_s21, 1 }
   0xf   : > { %s3877_s27 = scalar_select %p356_p1, %s3741_s20, %s358_s25  }
  0x10   : > { %p3879_p5 = por %p369_p2, %p368_p0  ;;  %p3883_p6 = por %p375_p4, %p374_p3 }
  0x11   : > { %4459 = sst [smem:[#allocation19_spill]] %s3877_s27  ;;  %p382_p8 = scmp.lt.s32.totalorder %s3745_s21, 3 }
  0x12   : > { %s4461_s29 = scalar_select %p3883_p6, 1, 0 }
  0x13   : > { %p3435_p9 = scmp.eq.s32.totalorder %s3862_s22, 0  ;;  %p3890_p10 = pnand %p3009_p7, %p382_p8 }
  0x14   : > { %4462 = sst [smem:[#allocation20_spill]] %s4461_s29  ;;  %s3747_s16 = smov [#allocation6]  }
  0x15   : > { %s423_s17 = sshll.u32 %s3747_s16, 4  ;;  %p3418_p11 = pneg %p3890_p10  ;;  %s424_s17 = int_to_ptr.vmem [resolvable:$true] %s423_s17 }
  0x16   : > { %s3748_s23 = smov [#allocation3]   ;;  %s3749_s27 = smov [#allocation8]  }
  0x17   : > { %s397_s25 = sshll.u32 %s3748_s23, 4  ;;  %p3898_p12 = pnand %p3435_p9, %p3418_p11  ;;  %s3902_s25 = int_to_ptr.vmem [resolvable:$true] %s397_s25 }
  0x18   : > { %s437_s20 = sshll.u32 %s3749_s27, 4  ;;  %s3580_s24 = scalar_lea.vmem %s424_s17, 16  ;;  %s438_s20 = int_to_ptr.vmem [resolvable:$true] %s437_s20 }
  0x19   : > { %p3571_p13 = pneg %p3898_p12  ;;  %p3581_p0 = scmp.ne.s32.totalorder %s424_s17, %s3580_s24 }
  0x1a   : > { %s3587_s16 = scalar_lea.vmem %s424_s17, 32  ;;  %p3588_p3 = scmp.lt.s32.totalorder %s424_s17, %s424_s17 }
  0x1b   : > { %p3583_p1 = pnand %p3581_p0, %p3571_p13  ;;  %p3589_p4 = scmp.lt.s32.totalorder %s3587_s16, %s3580_s24 }
  0x1d   : > { %p3584_p2 = pneg %p3583_p1  ;;  %p3590_p7 = por %p3589_p4, %p3588_p3 }
  0x1f   : > { %p3591_p8 = pnand %p3590_p7, %p3584_p2 }
  0x21   : > { %3594 = shalt.err (!%p3591_p8)
}
  0x22   : > { %s4465_s7 = sld [smem:[#allocation21_spill]]  ;;  %s3606_s27 = scalar_lea.vmem %s3902_s25, 256 }
  0x23   : > { %p3607_p11 = scmp.ne.s32.totalorder %s3902_s25, %s3606_s27  ;;  %p3614_p3 = scmp.lt.s32.totalorder %s3902_s25, %s3902_s25 }
  0x24   : > { %p3615_p2 = scmp.lt.s32.totalorder %s3606_s27, %s3606_s27 }
  0x25   : > { %p3609_p0 = pnand %p3607_p11, %p3571_p13 }
  0x26   : > { %p3616_p4 = por %p3615_p2, %p3614_p3 }
  0x27   : > { %p3610_p1 = pneg %p3609_p0 }
  0x28   : > { %3424 = dma.hbm_to_vmem [thread:$0]  (!%p3898_p12), %s4465_s7, 16, %s424_s17, [#allocation7]  }
  0x29   : > { %p3617_p7 = pnand %p3616_p4, %p3610_p1 }
  0x2b   : > { %3620 = shalt.err (!%p3617_p7)
}
  0x2c   : > { %s3750_s24 = smov 128   ;;  %s3751_s29 = smov 8  }
  0x2d   : > { %3421 = dma.hbm_to_vmem [thread:$0]  (!%p3898_p12), %s4436_s2, 256, %s3902_s25, [#allocation4], %s3750_s24, %s3750_s24, %s3751_s29  }
  0x2e   : > { %s3632_s23 = scalar_lea.vmem %s438_s20, 16  ;;  %s3639_s27 = scalar_lea.vmem %s438_s20, 32 }
  0x2f   : > { %p3633_p8 = scmp.ne.s32.totalorder %s438_s20, %s3632_s23  ;;  %p3640_p1 = scmp.lt.s32.totalorder %s438_s20, %s438_s20 }
  0x30   : > { %p3641_p3 = scmp.lt.s32.totalorder %s3639_s27, %s3632_s23 }
  0x31   : > { %p3635_p11 = pnand %p3633_p8, %p3571_p13 }
  0x32   : > { %p3642_p2 = por %p3641_p3, %p3640_p1 }
  0x33   : > { %p3636_p0 = pneg %p3635_p11 }
  0x35   : > { %p3643_p4 = pnand %p3642_p2, %p3636_p0 }
  0x37   : > { %3646 = shalt.err (!%p3643_p4)
}
  0x38   : > { %3427 = dma.hbm_to_vmem [thread:$0]  (!%p3898_p12), %s4443_s9, 16, %s438_s20, [#allocation7]  }
  0x39   : > { %s3752_s25 = smov [#allocation9]  }
  0x3a   : > { %s451_s24 = sshll.u32 %s3752_s25, 4  ;;  %s452_s24 = int_to_ptr.vmem [resolvable:$true] %s451_s24 }
  0x3b   : > { %s3658_s29 = scalar_lea.vmem %s452_s24, 16  ;;  %s3665_s16 = scalar_lea.vmem %s452_s24, 32 }
  0x3c   : > { %p3659_p7 = scmp.ne.s32.totalorder %s452_s24, %s3658_s29  ;;  %p3666_p1 = scmp.lt.s32.totalorder %s452_s24, %s452_s24 }
  0x3d   : > { %p3667_p0 = scmp.lt.s32.totalorder %s3665_s16, %s3658_s29 }
  0x3e   : > { %p3661_p8 = pnand %p3659_p7, %p3571_p13 }
  0x3f   : > { %p3668_p3 = por %p3667_p0, %p3666_p1 }
  0x40   : > { %p3662_p11 = pneg %p3661_p8 }
  0x42   : > { %p3669_p2 = pnand %p3668_p3, %p3662_p11 }
  0x44   : > { %3672 = shalt.err (!%p3669_p2)
}
  0x45   : > { %3430 = dma.hbm_to_vmem [thread:$0]  (!%p3898_p12), %s4445_s11, 16, %s452_s24, [#allocation10]  }
  0x46   : > { %483 = sbr.rel (%p3890_p10) target bundleno = 5059 (0x13c3), region = 80 }
  0x4b   : > { %3716 = dma.done.wait (%p3435_p9), [#allocation4], 256  }
  0x4c   : > { %3718 = vsyncadd (%p3435_p9), [#allocation4], 4294967040 }
  0x4d   : > { %3720 = dma.done.wait (%p3435_p9), [#allocation7], 32  }
  0x4e   : > { %3722 = vsyncadd (%p3435_p9), [#allocation7], 4294967264 }
  0x4f   : > { %3724 = dma.done.wait (%p3435_p9), [#allocation10], 16  }
  0x50   : > { %3726 = vsyncadd (%p3435_p9), [#allocation10], 4294967280  ;;  %s3021_s20 = sshll.u32 %s3862_s22, 1  ;;  %v561_v0 = vld [vmem:[%s4437_s3 + $0x28] sm:$0xff]  ;;  %v560_v1 = vld [vmem:[%s4437_s3 + $0x20] sm:$0xff]  ;;  %vm562_vm0 = vcmask 392192  }
  0x51   : > { %p545_p10 = scmp.lt.s32.totalorder %s3021_s20, 3  ;;  %3214 = vmatprep.subr.mxu0 %v561_v0  ;;  %v559_v2 = vld [vmem:[%s4437_s3 + $0x18] sm:$0xff]  ;;  %v558_v4 = vld [vmem:[%s4437_s3 + $0x10] sm:$0xff]  ;;  %v557_v5 = vld [vmem:[%s4437_s3 + $0x8] sm:$0xff]  ;;  %vm662_vm1 = vcmask 261120   ;;  %vm966_vm2 = vcmask 64512  }
  0x52   : > { %3215 = vmatpush3.msra.mxu0 %v561_v0  ;;  %v556_v6 = vld [vmem:[%s4437_s3] sm:$0xff]  ;;  %v745_v33 = vld [vmem:[%s4440_s6 + $0x18] sm:$0xff]  ;;  %v744_v34 = vld [vmem:[%s4440_s6 + $0x10] sm:$0xff]  ;;  %s3754_s29 = smov 112   ;;  %vm1054_vm3 = vcmask 130048   ;;  %s3755_s17 = smov 104  }
  0x53   : > { %s4474_s20 = smov (!%p545_p10, %s3021_s20), 3  ;;  %3216 = vmatprep.subr.mxu0 %v560_v1  ;;  %3232 = vmatprep.subr.mxu1 %v745_v33  ;;  %v743_v35 = vld [vmem:[%s4440_s6 + $0x8] sm:$0xff]  ;;  %v742_v36 = vld [vmem:[%s4440_s6] sm:$0xff]  ;;  %s3758_s7 = smov 24   ;;  %vm1372_vm4 = vcmask 130112   ;;  %vm1583_vm5 = vcmask 195712  }
  0x54   : > { %s3105_s30 = sshll.u32 %s4474_s20, 4  ;;  %3217 = vmatpush3.msra.mxu0 %v560_v1  ;;  %3233 = vmatpush3.msra.mxu1 %v745_v33  ;;  %v3028_v52 = vld [vmem:[%s4438_s4] ss:$0 sm:$0xff]  ;;  %v737_v63 = vld [vmem:[#allocation3 + $0x8] sm:$0xff]  ;;  %vm1794_vm6 = vcmask 261312  }
  0x55   : > { %s549_s23 = scalar_lea.vmem %s4434_s0, %s3105_s30  ;;  %3218 = vmatprep.subr.mxu0 %v559_v2  ;;  %3234 = vmatprep.subr.mxu1 %v744_v34  ;;  %v3029_v54 = vld [vmem:[%s4439_s5] ss:$0 sm:$0xff]  ;;  %s3107_s30 = sshll.u32 %s3862_s22, 9 }
  0x56   : > { %v552_v3 = vld [vmem:[%s549_s23] sm:$0xff]  ;;  %3219 = vmatpush3.msra.mxu0 %v559_v2  ;;  %v553_v7 = vld [vmem:[%s549_s23 + $0x8] sm:$0xff]  ;;  %v554_v8 = vld [vmem:[%s549_s23 + $0x10] sm:$0xff]  ;;  %3235 = vmatpush3.msra.mxu1 %v744_v34  ;;  %s4390_s27 = scalar_lea.hbm %s4449_s15, %s3107_s30  ;;  %s3759_s22 = smov [#allocation11]  }
  0x57   : > { %3226 = vmatprep.mubr.msk.f32.mxu0 %vm562_vm0, %v552_v3  ;;  %3220 = vmatprep.subr.mxu0 %v558_v4  ;;  %v555_v9 = vld [vmem:[%s549_s23 + $0x18] sm:$0xff]  ;;  %v736_v57 = vld [vmem:[#allocation3] sm:$0xff]  ;;  %s3753_s23 = smov 120   ;;  %s3677_s16 = sshll.u32 %s3759_s22, 4  ;;  %s3678_s16 = int_to_ptr.vmem [resolvable:$false] %s3677_s16 }
  0x58   : > { %3221 = vmatpush3.msra.mxu0 %v558_v4  ;;  %3236 = vmatprep.subr.mxu1 %v743_v35  ;;  %v853_v4 = vld [vmem:[%s4442_s8 + $0x18] sm:$0xff] }
  0x59   : > { %3222 = vmatprep.subr.mxu0 %v557_v5  ;;  %3237 = vmatpush3.msra.mxu1 %v743_v35  ;;  %v4107_v35 = vld [vmem:[#allocation8] ss:$0 sm:$0xff] }
  0x5a   : > { %3223 = vmatpush3.msra.mxu0 %v557_v5  ;;  %3238 = vmatprep.subr.mxu1 %v742_v36  ;;  %v852_v5 = vld [vmem:[%s4442_s8 + $0x10] sm:$0xff] }
  0x5b   : > { %3224 = vmatprep.subr.mxu0 %v556_v6  ;;  %3239 = vmatpush3.msra.mxu1 %v742_v36 }
  0x5c   : > { %3225 = vmatpush3.msra.mxu0 %v556_v6  ;;  %3246 = vmatprep.subr.mxu1 %v853_v4 }
  0x5d   : > { %3227 = vmatmul.mubr.msk.f32.vlgmr.msra.gmra.mxu0 %vm562_vm0, %v553_v7 }
  0x5e   : > { %3229 = vmatprep.mubr.msk.f32.mxu0 %vm562_vm0, %v554_v8  ;;  %v851_v8 = vld [vmem:[%s4442_s8 + $0x8] sm:$0xff] }
  0x61   : > { %3230 = vmatmul.mubr.msk.f32.gmra.mxu0 %vm562_vm0, %v555_v9  ;;  %v850_v9 = vld [vmem:[%s4442_s8] sm:$0xff] }
 0x11d   : > { %v3228_v10 = vpop.f32.mrf.mxu0 }
 0x11e   : > { %v666_v15 = vsel %vm662_vm1, %v3228_v10, 0.0 }
 0x11f   : > { %v641_v11 = vpop.f32.mrf.mxu0 }
 0x120   : > { %v663_v12 = vsel %vm662_vm1, %v641_v11, 0.0 }
 0x121   : > { %664 = vadd.xlane.f32.xlu0 %v663_v12  ;;  %v3231_v13 = vpop.f32.mrf.mxu0 }
 0x122   : > { %v672_v30 = vsel %vm662_vm1, %v3231_v13, 0.0 }
 0x123   : > { %v651_v14 = vpop.f32.mrf.mxu0 }
 0x124   : > { %v669_v16 = vsel %vm662_vm1, %v651_v14, 0.0 }
 0x125   : > { %667 = vadd.xlane.f32.xlu0 %v666_v15 }
 0x129   : > { %670 = vadd.xlane.f32.xlu0 %v669_v16 }
 0x1aa   : > { %v665_v17 = vpop.xlane.xlu0 %664 }
 0x1ab   : > { %v676_v18 = vmul.f32 0.03125, %v665_v17 }
 0x1ad   : > { %v680_v19 = vsub.f32 %v641_v11, %v676_v18 }
 0x1ae   : > { %v668_v20 = vpop.xlane.xlu0 %667 }
 0x1af   : > { %v677_v21 = vmul.f32 0.03125, %v668_v20  ;;  %v684_v22 = vmul.f32 %v680_v19, %v680_v19  ;;  %v4043_v20 = vld [vmem:[#allocation6] ss:$0 sm:$0xff] }
 0x1b1   : > { %v681_v23 = vsub.f32 %v3228_v10, %v677_v21  ;;  %v688_v24 = vsel %vm662_vm1, %v684_v22, 0.0  ;;  %v4027_v10 = vld [vmem:[%s4435_s1] sm:$0xff] }
 0x1b2   : > { %689 = vadd.xlane.f32.xlu1 %v688_v24  ;;  %v671_v25 = vpop.xlane.xlu0 %670  ;;  %3264 = vmatprep.mubr.msk.f32.mxu0 %vm966_vm2, %v4027_v10 }
 0x1b3   : > { %v678_v26 = vmul.f32 0.03125, %v671_v25  ;;  %v685_v27 = vmul.f32 %v681_v23, %v681_v23  ;;  %v4066_v25 = vld [vmem:[%s4435_s1 + $0x8] sm:$0xff] }
 0x1b5   : > { %v682_v28 = vsub.f32 %v651_v14, %v678_v26  ;;  %v691_v29 = vsel %vm662_vm1, %v685_v27, 0.0 }
 0x1b6   : > { %692 = vadd.xlane.f32.xlu1 %v691_v29  ;;  %v4081_v29 = vld [vmem:[%s4435_s1 + $0x18] sm:$0xff] }
 0x1b7   : > { %v686_v31 = vmul.f32 %v682_v28, %v682_v28 }
 0x1b9   : > { %v694_v32 = vsel %vm662_vm1, %v686_v31, 0.0 }
 0x1ba   : > { %673 = vadd.xlane.f32.xlu1 %v672_v30  ;;  %695 = vadd.xlane.f32.xlu0 %v694_v32  ;;  %v4087_v30 = vld [vmem:[%s4435_s1 + $0x20] sm:$0xff]  ;;  %v4099_v32 = vld [vmem:[%s4435_s1 + $0x28] sm:$0xff] }
 0x23b   : > { %v690_v37 = vpop.xlane.xlu1 %689 }
 0x23c   : > { %v700_v38 = vmul.f32 0.03125, %v690_v37 }
 0x23e   : > { %v704_v39 = vadd.f32 1e-06, %v700_v38 }
 0x23f   : > { %v693_v40 = vpop.xlane.xlu1 %692 }
 0x240   : > { %3489 = vrsqrt.f32 %v704_v39  ;;  %v701_v41 = vmul.f32 0.03125, %v693_v40 }
 0x242   : > { %v705_v42 = vadd.f32 1e-06, %v701_v41 }
 0x243   : > { %v674_v43 = vpop.xlane.xlu1 %673  ;;  %v696_v44 = vpop.xlane.xlu0 %695 }
 0x244   : > { %3491 = vrsqrt.f32 %v705_v42  ;;  %v679_v45 = vmul.f32 0.03125, %v674_v43  ;;  %v702_v46 = vmul.f32 0.03125, %v696_v44 }
 0x246   : > { %v683_v47 = vsub.f32 %v3231_v13, %v679_v45  ;;  %v706_v48 = vadd.f32 1e-06, %v702_v46 }
 0x248   : > { %3493 = vrsqrt.f32 %v706_v48  ;;  %v687_v49 = vmul.f32 %v683_v47, %v683_v47 }
 0x24a   : > { %v697_v50 = vsel %vm662_vm1, %v687_v49, 0.0 }
 0x24b   : > { %698 = vadd.xlane.f32.xlu1 %v697_v50 }
 0x24d   : > { %v3490_v51 = vpop.eup %3489 }
 0x24e   : > { %v712_v53 = vmul.f32 %v3490_v51, %v680_v19  ;;  %v4039_v19 = vld [vmem:[%s4435_s1 + $0x10] sm:$0xff] }
 0x250   : > { %v722_v55 = vmul.f32 %v3028_v52, %v712_v53 }
 0x251   : > { %v3492_v56 = vpop.eup %3491 }
 0x252   : > { %v732_v58 = vadd.f32 %v3029_v54, %v722_v55  ;;  %v713_v59 = vmul.f32 %v3492_v56, %v681_v23 }
 0x254   : > { %v738_v60 = vadd.f32 %v736_v57, %v732_v58  ;;  %v723_v61 = vmul.f32 %v3028_v52, %v713_v59 }
 0x255   : > { %v3494_v62 = vpop.eup %3493 }
 0x256   : > { %v714_v0 = vmul.f32 %v3494_v62, %v682_v28  ;;  %3240 = vmatprep.mubr.msk.f32.mxu1 %vm662_vm1, %v738_v60  ;;  %v733_v1 = vadd.f32 %v3029_v54, %v723_v61 }
 0x258   : > { %v724_v2 = vmul.f32 %v3028_v52, %v714_v0  ;;  %v739_v3 = vadd.f32 %v737_v63, %v733_v1 }
 0x25a   : > { %v734_v6 = vadd.f32 %v3029_v54, %v724_v2  ;;  %3241 = vmatmul.mubr.msk.f32.vlgmr.msra.gmra.mxu1 %vm662_vm1, %v739_v3 }
 0x25b   : > { %3247 = vmatpush3.msra.mxu1 %v853_v4 }
 0x25c   : > { %v740_v7 = vadd.f32 %v736_v57, %v734_v6  ;;  %3248 = vmatprep.subr.mxu1 %v852_v5 }
 0x25d   : > { %3249 = vmatpush3.msra.mxu1 %v852_v5 }
 0x25e   : > { %3243 = vmatprep.mubr.msk.f32.mxu1 %vm662_vm1, %v740_v7  ;;  %3250 = vmatprep.subr.mxu1 %v851_v8 }
 0x25f   : > { %3251 = vmatpush3.msra.mxu1 %v851_v8 }
 0x260   : > { %3252 = vmatprep.subr.mxu1 %v850_v9 }
 0x261   : > { %3253 = vmatpush3.msra.mxu1 %v850_v9 }
 0x2d4   : > { %v699_v11 = vpop.xlane.xlu1 %698 }
 0x2d5   : > { %v703_v12 = vmul.f32 0.03125, %v699_v11 }
 0x2d7   : > { %v707_v13 = vadd.f32 1e-06, %v703_v12 }
 0x2d9   : > { %3495 = vrsqrt.f32 %v707_v13 }
 0x2e6   : > { %v3496_v14 = vpop.eup %3495 }
 0x2e7   : > { %v715_v15 = vmul.f32 %v3496_v14, %v683_v47 }
 0x2e9   : > { %v725_v16 = vmul.f32 %v3028_v52, %v715_v15 }
 0x2eb   : > { %v735_v17 = vadd.f32 %v3029_v54, %v725_v16 }
 0x2ed   : > { %v741_v18 = vadd.f32 %v737_v63, %v735_v17 }
 0x2ef   : > { %3244 = vmatmul.mubr.msk.f32.gmra.mxu1 %vm662_vm1, %v741_v18 }
 0x2f0   : > { %3254 = vmatprep.mubr.msk.f32.mxu1 %vm662_vm1, %v732_v58 }
 0x2f3   : > { %3255 = vmatmul.mubr.msk.f32.vlgmr.msra.gmra.mxu1 %vm662_vm1, %v733_v1 }
 0x2f4   : > { %3257 = vmatprep.mubr.msk.f32.mxu1 %vm662_vm1, %v734_v6 }
 0x2f7   : > { %3258 = vmatmul.mubr.msk.f32.gmra.mxu1 %vm662_vm1, %v735_v17 }
 0x2f8   : > { %3278 = vmatprep.mubr.msk.f32.mxu1 %vm966_vm2, %v4039_v19 }
 0x31a   : > { %v3242_v21 = vpop.f32.mrf.mxu1 }
 0x31b   : > { %v4046_v22 = vadd.f32 %v3242_v21, %v4043_v20 }
 0x31c   : > { %v831_v23 = vpop.f32.mrf.mxu1 }
 0x31d   : > { %v4049_v24 = vadd.f32 %v4043_v20, %v831_v23  ;;  %3260 = vmatprep.subr.msk.mxu0 %vm966_vm2, %v4046_v22  ;;  %1164 = vrot.lane.b32.xlu0 %v4046_v22, %s3753_s23 }
 0x31e   : > { %3261 = vmatpush3.xpose.msk.msra.mxu0 %vm966_vm2, %v4046_v22 }
 0x31f   : > { %3262 = vmatprep.subr.msk.mxu0 %vm966_vm2, %v4049_v24  ;;  %1162 = vrot.lane.b32.xlu1 %v4049_v24, %s3753_s23 }
 0x322   : > { %3263 = vmatpush3.xpose.msk.msra.mxu0 %vm966_vm2, %v4049_v24 }
 0x323   : > { %1377 = vrot.lane.b32.xlu1 %v4046_v22, %s3754_s29 }
 0x325   : > { %3265 = vmatmul.mubr.msk.f32.vlgmr.msra.gmra.mxu0 %vm966_vm2, %v4066_v25 }
 0x327   : > { %1375 = vrot.lane.b32.xlu1 %v4049_v24, %s3754_s29 }
 0x38f   : > { %v1165_v26 = vpop.permute.xlu0 %1164 }
 0x390   : > { %3274 = vmatprep.subr.msk.mxu1 %vm966_vm2, %v1165_v26 }
 0x391   : > { %v1163_v27 = vpop.permute.xlu1 %1162  ;;  %3275 = vmatpush3.xpose.msk.msra.mxu1 %vm966_vm2, %v1165_v26 }
 0x392   : > { %3276 = vmatprep.subr.msk.mxu1 %vm966_vm2, %v1163_v27 }
 0x395   : > { %v1378_v28 = vpop.permute.xlu1 %1377  ;;  %3277 = vmatpush3.xpose.msk.msra.mxu1 %vm966_vm2, %v1163_v27 }
 0x396   : > { %3288 = vmatprep.subr.msk.mxu1 %vm966_vm2, %v1378_v28 }
 0x398   : > { %3279 = vmatmul.mubr.msk.f32.vlgmr.msra.gmra.mxu1 %vm966_vm2, %v4081_v29 }
 0x399   : > { %v1376_v31 = vpop.permute.xlu1 %1375  ;;  %3289 = vmatpush3.xpose.msk.msra.mxu1 %vm966_vm2, %v1378_v28  ;;  %3292 = vmatprep.mubr.msk.f32.mxu1 %vm966_vm2, %v4087_v30 }
 0x39a   : > { %3290 = vmatprep.subr.msk.mxu1 %vm966_vm2, %v1376_v31 }
 0x39d   : > { %3291 = vmatpush3.xpose.msk.msra.mxu1 %vm966_vm2, %v1376_v31 }
 0x3a0   : > { %3293 = vmatmul.mubr.msk.f32.vlgmr.msra.gmra.mxu1 %vm966_vm2, %v4099_v32 }
 0x3af   : > { %v4103_v33 = vpop.f32.mrf.mxu1 }
 0x3b1   : > { %v4105_v34 = vpop.f32.mrf.mxu1 }
 0x3b3   : > { %v3256_v36 = vpop.f32.mrf.mxu1 }
 0x3b4   : > { %v4110_v37 = vadd.f32 %v3256_v36, %v4107_v35 }
 0x3b5   : > { %v939_v38 = vpop.f32.mrf.mxu1 }
 0x3b6   : > { %v4113_v39 = vadd.f32 %v4107_v35, %v939_v38  ;;  %3267 = vmatprep.subr.mxu0 %v4110_v37 }
 0x3b7   : > { %v3259_v40 = vpop.f32.mrf.mxu1  ;;  %3268 = vmatpush3.msra.mxu0 %v4110_v37 }
 0x3b8   : > { %v4118_v41 = vadd.f32 %v3259_v40, %v4107_v35  ;;  %3269 = vmatprep.subr.mxu0 %v4113_v39 }
 0x3b9   : > { %3270 = vmatpush3.msra.mxu0 %v4113_v39  ;;  %v4124_v46 = vpop.f32.mrf.mxu1 }
 0x3e5   : > { %v3266_v42 = vpop.f32.mrf.mxu0 }
 0x3e6   : > { %v1058_v43 = vsel %vm1054_vm3, %v3266_v42, -inf }
 0x3e7   : > { %1059 = vmax.xlane.f32.xlu1 %v1058_v43  ;;  %v1045_v44 = vpop.f32.mrf.mxu0 }
 0x3e8   : > { %v1055_v45 = vsel %vm1054_vm3, %v1045_v44, -inf }
 0x3e9   : > { %1056 = vmax.xlane.f32.xlu0 %v1055_v45 }
 0x458   : > { %v3280_v47 = vpop.f32.mrf.mxu1 }
 0x459   : > { %v1254_v48 = vsel %vm1054_vm3, %v3280_v47, -inf }
 0x45a   : > { %1255 = vmax.xlane.f32.xlu0 %v1254_v48  ;;  %v1242_v49 = vpop.f32.mrf.mxu1 }
 0x45b   : > { %v1251_v50 = vsel %vm1054_vm3, %v1242_v49, -inf }
 0x45e   : > { %1252 = vmax.xlane.f32.xlu0 %v1251_v50 }
 0x460   : > { %v3294_v51 = vpop.f32.mrf.mxu1 }
 0x461   : > { %v1467_v52 = vsel %vm1054_vm3, %v3294_v51, -inf }
 0x462   : > { %1468 = vmax.xlane.f32.xlu1 %v1467_v52  ;;  %v1455_v53 = vpop.f32.mrf.mxu1 }
 0x463   : > { %v1464_v54 = vsel %vm1054_vm3, %v1455_v53, -inf }
 0x464   : > { %1465 = vmax.xlane.f32.xlu0 %v1464_v54 }
 0x470   : > { %v1060_v57 = vpop.xlane.xlu1 %1059 }
 0x471   : > { %v1062_v59 = vsub.f32 %v3266_v42, %v1060_v57 }
 0x472   : > { %v1057_v55 = vpop.xlane.xlu0 %1056 }
 0x473   : > { %1277 = vrot.lane.b32.xlu1 %v4113_v39, %s3753_s23  ;;  %v1061_v56 = vsub.f32 %v1045_v44, %v1057_v55  ;;  %v1065_v60 = vmul.f32 1.442695, %v1062_v59 }
 0x475   : > { %v1063_v58 = vmul.f32 1.442695, %v1061_v56 }
 0x477   : > { %1490 = vrot.lane.b32.xlu1 %v4110_v37, %s3754_s29  ;;  %3497 = vpow2.f32 %v1063_v58  ;;  %v4156_v58 = vld [vmem:[%s4435_s1 + $0x30] sm:$0xff] }
 0x478   : > { %3499 = vpow2.f32 %v1065_v60  ;;  %v4168_v60 = vld [vmem:[%s4435_s1 + $0x38] sm:$0xff] }
 0x47a   : > { %1279 = vrot.lane.b32.xlu0 %v4110_v37, %s3753_s23 }
 0x47b   : > { %1488 = vrot.lane.b32.xlu1 %v4113_v39, %s3754_s29 }
 0x484   : > { %v3498_v61 = vpop.eup %3497 }
 0x485   : > { %v1067_v62 = vsel %vm1054_vm3, %v3498_v61, 0.0  ;;  %v3500_v63 = vpop.eup %3499 }
 0x486   : > { %v1070_v0 = vsel %vm1054_vm3, %v3500_v63, 0.0 }
 0x499   : > { %1068 = vadd.xlane.f32.xlu0 %v1067_v62 }
 0x49f   : > { %1071 = vadd.xlane.f32.xlu1 %v1070_v0 }
 0x4e3   : > { %v1256_v1 = vpop.xlane.xlu0 %1255 }
 0x4e4   : > { %v1258_v2 = vsub.f32 %v3280_v47, %v1256_v1 }
 0x4e6   : > { %v1261_v3 = vmul.f32 1.442695, %v1258_v2 }
 0x4e7   : > { %v1253_v4 = vpop.xlane.xlu0 %1252 }
 0x4e8   : > { %3501 = vpow2.f32 %v1261_v3  ;;  %v1257_v5 = vsub.f32 %v1242_v49, %v1253_v4 }
 0x4ea   : > { %v1259_v6 = vmul.f32 1.442695, %v1257_v5 }
 0x4eb   : > { %v1469_v7 = vpop.xlane.xlu1 %1468 }
 0x4ec   : > { %3503 = vpow2.f32 %v1259_v6  ;;  %v1471_v8 = vsub.f32 %v3294_v51, %v1469_v7 }
 0x4ed   : > { %v1466_v9 = vpop.xlane.xlu0 %1465 }
 0x4ee   : > { %v1474_v11 = vmul.f32 1.442695, %v1471_v8  ;;  %v1470_v12 = vsub.f32 %v1455_v53, %v1466_v9 }
 0x4ef   : > { %v1278_v28 = vpop.permute.xlu1 %1277 }
 0x4f0   : > { %3505 = vpow2.f32 %v1474_v11  ;;  %v1472_v13 = vmul.f32 1.442695, %v1470_v12 }
 0x4f1   : > { %v1280_v14 = vpop.permute.xlu0 %1279 }
 0x4f2   : > { %3507 = vpow2.f32 %v1472_v13  ;;  %3281 = vmatprep.subr.mxu0 %v1280_v14 }
 0x4f3   : > { %v1491_v31 = vpop.permute.xlu1 %1490 }
 0x4f5   : > { %v3502_v15 = vpop.eup %3501 }
 0x4f6   : > { %v1266_v16 = vsel %vm1054_vm3, %v3502_v15, 0.0 }
 0x4f7   : > { %1267 = vadd.xlane.f32.xlu1 %v1266_v16  ;;  %v1489_v38 = vpop.permute.xlu1 %1488 }
 0x4f9   : > { %v3504_v17 = vpop.eup %3503 }
 0x4fa   : > { %v1263_v18 = vsel %vm1054_vm3, %v3504_v17, 0.0 }
 0x4fb   : > { %1264 = vadd.xlane.f32.xlu0 %v1263_v18 }
 0x4fd   : > { %v3506_v21 = vpop.eup %3505 }
 0x4fe   : > { %v1479_v23 = vsel %vm1054_vm3, %v3506_v21, 0.0 }
 0x4ff   : > { %v3508_v26 = vpop.eup %3507  ;;  %1480 = vadd.xlane.f32.xlu1 %v1479_v23  ;;  %v4200_v23 = vadd.f32 %v4103_v33, %v4043_v20 }
 0x500   : > { %v1476_v27 = vsel %vm1054_vm3, %v3508_v26, 0.0 }
 0x501   : > { %1477 = vadd.xlane.f32.xlu0 %v1476_v27 }
 0x510   : > { %1586 = vrot.lane.b32.xlu1 %v4049_v24, %s3755_s17 }
 0x517   : > { %1588 = vrot.lane.b32.xlu0 %v4046_v22, %s3755_s17 }
 0x522   : > { %v1069_v36 = vpop.xlane.xlu0 %1068 }
 0x523   : > { %3509 = vrcp.f32 %v1069_v36 }
 0x528   : > { %v1072_v40 = vpop.xlane.xlu1 %1071 }
 0x529   : > { %3511 = vrcp.f32 %v1072_v40 }
 0x530   : > { %v3510_v42 = vpop.eup %3509 }
 0x531   : > { %v1077_v43 = vmul.f32 %v3510_v42, %v3498_v61  ;;  %v4173_v61 = vadd.f32 %v4107_v35, %v4124_v46 }
 0x533   : > { %3271 = vmatprep.mubr.msk.f32.mxu0 %vm1054_vm3, %v1077_v43 }
 0x536   : > { %v3512_v44 = vpop.eup %3511 }
 0x537   : > { %v1078_v45 = vmul.f32 %v3512_v44, %v3500_v63 }
 0x539   : > { %3272 = vmatmul.mubr.msk.f32.vlgmr.msra.gmra.mxu0 %vm1054_vm3, %v1078_v45 }
 0x53a   : > { %3282 = vmatpush3.msra.mxu0 %v1280_v14 }
 0x53b   : > { %3283 = vmatprep.subr.mxu0 %v1278_v28 }
 0x53c   : > { %3284 = vmatpush3.msra.mxu0 %v1278_v28 }
 0x53d   : > { %3295 = vmatprep.subr.mxu0 %v1491_v31 }
 0x580   : > { %v1268_v22 = vpop.xlane.xlu1 %1267 }
 0x581   : > { %3513 = vrcp.f32 %v1268_v22 }
 0x584   : > { %v1265_v24 = vpop.xlane.xlu0 %1264 }
 0x585   : > { %3515 = vrcp.f32 %v1265_v24 }
 0x588   : > { %v1481_v47 = vpop.xlane.xlu1 %1480 }
 0x589   : > { %3517 = vrcp.f32 %v1481_v47 }
 0x58a   : > { %v1478_v48 = vpop.xlane.xlu0 %1477 }
 0x58b   : > { %3519 = vrcp.f32 %v1478_v48 }
 0x58c   : > { %v1587_v59 = vpop.permute.xlu1 %1586 }
 0x58e   : > { %v3514_v49 = vpop.eup %3513  ;;  %v1589_v55 = vpop.permute.xlu0 %1588 }
 0x58f   : > { %v1274_v52 = vmul.f32 %v3514_v49, %v3502_v15 }
 0x592   : > { %v3516_v50 = vpop.eup %3515 }
 0x593   : > { %v1273_v51 = vmul.f32 %v3516_v50, %v3504_v17 }
 0x595   : > { %3285 = vmatprep.mubr.msk.f32.mxu0 %vm1054_vm3, %v1273_v51 }
 0x596   : > { %3286 = vmatmul.mubr.msk.f32.vlgmr.msra.gmra.mxu0 %vm1054_vm3, %v1274_v52  ;;  %v3518_v53 = vpop.eup %3517 }
 0x597   : > { %3296 = vmatpush3.msra.mxu0 %v1491_v31  ;;  %v1487_v57 = vmul.f32 %v3518_v53, %v3506_v21  ;;  %v4207_v31 = vadd.f32 %v4043_v20, %v4105_v34 }
 0x598   : > { %v3520_v54 = vpop.eup %3519  ;;  %3297 = vmatprep.subr.mxu0 %v1489_v38 }
 0x599   : > { %3298 = vmatpush3.msra.mxu0 %v1489_v38  ;;  %v1486_v56 = vmul.f32 %v3520_v54, %v3508_v26 }
 0x59a   : > { %3302 = vmatprep.subr.msk.mxu0 %vm966_vm2, %v1589_v55 }
 0x59b   : > { %3299 = vmatprep.mubr.msk.f32.mxu0 %vm1054_vm3, %v1486_v56 }
 0x59c   : > { %3300 = vmatmul.mubr.msk.f32.vlgmr.msra.gmra.mxu0 %vm1054_vm3, %v1487_v57 }
 0x59d   : > { %3303 = vmatpush3.xpose.msk.msra.mxu0 %vm966_vm2, %v1589_v55  ;;  %3306 = vmatprep.mubr.msk.f32.mxu0 %vm966_vm2, %v4156_v58 }
 0x59e   : > { %3304 = vmatprep.subr.msk.mxu0 %vm966_vm2, %v1587_v59 }
 0x5a1   : > { %3305 = vmatpush3.xpose.msk.msra.mxu0 %vm966_vm2, %v1587_v59 }
 0x5a2   : > { %3323 = vmatprep.subr.mxu0 %v4118_v41 }
 0x5a4   : > { %3307 = vmatmul.mubr.msk.f32.vlgmr.msra.gmra.mxu0 %vm966_vm2, %v4168_v60 }
 0x5a5   : > { %3324 = vmatpush3.msra.mxu0 %v4118_v41 }
 0x5a6   : > { %3325 = vmatprep.subr.mxu0 %v4173_v61 }
 0x5a7   : > { %3326 = vmatpush3.msra.mxu0 %v4173_v61 }
 0x5f9   : > { %v3273_v62 = vpop.f32.mrf.mxu0 }
 0x5fa   : > { %1161 = vst.msk [vmem:[#allocation2 + $0x8] sm:$0xff] %vm966_vm2, %v3273_v62 }
 0x5fb   : > { %v1151_v63 = vpop.f32.mrf.mxu0 }
 0x5fc   : > { %1160 = vst.msk [vmem:[#allocation2] sm:$0xff] %vm966_vm2, %v1151_v63 }
 0x656   : > { %v4182_v0 = vpop.f32.mrf.mxu0 }
 0x658   : > { %v4184_v1 = vpop.f32.mrf.mxu0 }
 0x65c   : > { %v4186_v35 = vpop.f32.mrf.mxu0 }
 0x65e   : > { %v4188_v46 = vpop.f32.mrf.mxu0 }
 0x664   : > { %v3308_v2 = vpop.f32.mrf.mxu0 }
 0x665   : > { %v1678_v3 = vsel %vm1054_vm3, %v3308_v2, -inf }
 0x666   : > { %1679 = vmax.xlane.f32.xlu1 %v1678_v3  ;;  %v1666_v4 = vpop.f32.mrf.mxu0 }
 0x667   : > { %v1675_v5 = vsel %vm1054_vm3, %v1666_v4, -inf }
 0x668   : > { %1676 = vmax.xlane.f32.xlu0 %v1675_v5 }
 0x677   : > { %1699 = vrot.lane.b32.xlu1 %v4113_v39, %s3755_s17 }
 0x6ef   : > { %v1680_v6 = vpop.xlane.xlu1 %1679 }
 0x6f0   : > { %v1682_v7 = vsub.f32 %v3308_v2, %v1680_v6 }
 0x6f1   : > { %v1677_v8 = vpop.xlane.xlu0 %1676 }
 0x6f2   : > { %v1685_v9 = vmul.f32 1.442695, %v1682_v7  ;;  %v1681_v11 = vsub.f32 %v1666_v4, %v1677_v8 }
 0x6f3   : > { %v1700_v21 = vpop.permute.xlu1 %1699 }
 0x6f4   : > { %3521 = vpow2.f32 %v1685_v9  ;;  %v1683_v12 = vmul.f32 1.442695, %v1681_v11 }
 0x6f6   : > { %3523 = vpow2.f32 %v1683_v12 }
 0x701   : > { %v3522_v13 = vpop.eup %3521 }
 0x702   : > { %v1690_v14 = vsel %vm1054_vm3, %v3522_v13, 0.0 }
 0x703   : > { %v3524_v15 = vpop.eup %3523  ;;  %1691 = vadd.xlane.f32.xlu0 %v1690_v14 }
 0x704   : > { %v1687_v16 = vsel %vm1054_vm3, %v3524_v15, 0.0 }
 0x707   : > { %1688 = vadd.xlane.f32.xlu0 %v1687_v16 }
 0x71d   : > { %1701 = vrot.lane.b32.xlu0 %v4110_v37, %s3755_s17 }
 0x78c   : > { %v1692_v39 = vpop.xlane.xlu0 %1691 }
 0x78d   : > { %3525 = vrcp.f32 %v1692_v39 }
 0x790   : > { %v1689_v17 = vpop.xlane.xlu0 %1688 }
 0x791   : > { %3527 = vrcp.f32 %v1689_v17 }
 0x794   : > { %v1702_v18 = vpop.permute.xlu0 %1701 }
 0x795   : > { %3309 = vmatprep.subr.mxu1 %v1702_v18 }
 0x796   : > { %3310 = vmatpush3.msra.mxu1 %v1702_v18 }
 0x797   : > { %3311 = vmatprep.subr.mxu1 %v1700_v21 }
 0x798   : > { %3312 = vmatpush3.msra.mxu1 %v1700_v21 }
 0x799   : > { %3316 = vmatprep.subr.msk.mxu1 %vm966_vm2, %v4200_v23 }
 0x79a   : > { %v3526_v26 = vpop.eup %3525 }
 0x79b   : > { %v1698_v28 = vmul.f32 %v3526_v26, %v3522_v13 }
 0x79e   : > { %v3528_v27 = vpop.eup %3527 }
 0x79f   : > { %v1697_v37 = vmul.f32 %v3528_v27, %v3524_v15 }
 0x7a1   : > { %3313 = vmatprep.mubr.msk.f32.mxu1 %vm1054_vm3, %v1697_v37 }
 0x7a2   : > { %3314 = vmatmul.mubr.msk.f32.vlgmr.msra.gmra.mxu1 %vm1054_vm3, %v1698_v28 }
 0x7a3   : > { %3317 = vmatpush3.xpose.msk.msra.mxu1 %vm966_vm2, %v4200_v23  ;;  %3320 = vmatprep.mubr.msk.f32.mxu1 %vm966_vm2, %v4027_v10 }
 0x7a4   : > { %3318 = vmatprep.subr.msk.mxu1 %vm966_vm2, %v4207_v31 }
 0x7a7   : > { %3319 = vmatpush3.xpose.msk.msra.mxu1 %vm966_vm2, %v4207_v31 }
 0x7aa   : > { %3321 = vmatmul.mubr.msk.f32.vlgmr.msra.gmra.mxu1 %vm966_vm2, %v4066_v25 }
 0x862   : > { %v4220_v33 = vpop.f32.mrf.mxu1 }
 0x864   : > { %v4222_v20 = vpop.f32.mrf.mxu1 }
 0x86a   : > { %v3322_v34 = vpop.f32.mrf.mxu1 }
 0x86b   : > { %v1881_v36 = vsel %vm1054_vm3, %v3322_v34, -inf }
 0x86c   : > { %1882 = vmax.xlane.f32.xlu0 %v1881_v36  ;;  %v1869_v38 = vpop.f32.mrf.mxu1 }
 0x86d   : > { %v1878_v10 = vsel %vm1054_vm3, %v1869_v38, -inf }
 0x86e   : > { %1879 = vmax.xlane.f32.xlu1 %v1878_v10 }
 0x8f5   : > { %v1883_v40 = vpop.xlane.xlu0 %1882 }
 0x8f6   : > { %v1885_v42 = vsub.f32 %v3322_v34, %v1883_v40 }
 0x8f7   : > { %v1880_v43 = vpop.xlane.xlu1 %1879 }
 0x8f8   : > { %v1888_v44 = vmul.f32 1.442695, %v1885_v42  ;;  %v1884_v45 = vsub.f32 %v1869_v38, %v1880_v43 }
 0x8fa   : > { %3529 = vpow2.f32 %v1888_v44  ;;  %v1886_v22 = vmul.f32 1.442695, %v1884_v45 }
 0x8fc   : > { %3531 = vpow2.f32 %v1886_v22 }
 0x907   : > { %v3530_v25 = vpop.eup %3529 }
 0x908   : > { %v1893_v24 = vsel %vm1054_vm3, %v3530_v25, 0.0 }
 0x909   : > { %v3532_v47 = vpop.eup %3531  ;;  %1894 = vadd.xlane.f32.xlu1 %v1893_v24 }
 0x90a   : > { %v1890_v48 = vsel %vm1054_vm3, %v3532_v47, 0.0 }
 0x90b   : > { %1891 = vadd.xlane.f32.xlu0 %v1890_v48 }
 0x91a   : > { %1985 = vrot.lane.b32.xlu1 %v4207_v31, %s3753_s23 }
 0x921   : > { %1987 = vrot.lane.b32.xlu0 %v4200_v23, %s3753_s23 }
 0x992   : > { %v1895_v49 = vpop.xlane.xlu1 %1894 }
 0x993   : > { %3533 = vrcp.f32 %v1895_v49 }
 0x994   : > { %v1892_v50 = vpop.xlane.xlu0 %1891 }
 0x995   : > { %3535 = vrcp.f32 %v1892_v50 }
 0x996   : > { %v1986_v56 = vpop.permute.xlu1 %1985 }
 0x998   : > { %v1988_v51 = vpop.permute.xlu0 %1987 }
 0x999   : > { %3330 = vmatprep.subr.msk.mxu0 %vm966_vm2, %v1988_v51 }
 0x9a0   : > { %v3534_v52 = vpop.eup %3533 }
 0x9a1   : > { %v1901_v55 = vmul.f32 %v3534_v52, %v3530_v25 }
 0x9a2   : > { %v3536_v53 = vpop.eup %3535 }
 0x9a3   : > { %v1900_v54 = vmul.f32 %v3536_v53, %v3532_v47 }
 0x9a5   : > { %3327 = vmatprep.mubr.msk.f32.mxu0 %vm1054_vm3, %v1900_v54 }
 0x9a6   : > { %3328 = vmatmul.mubr.msk.f32.vlgmr.msra.gmra.mxu0 %vm1054_vm3, %v1901_v55 }
 0x9a7   : > { %3331 = vmatpush3.xpose.msk.msra.mxu0 %vm966_vm2, %v1988_v51  ;;  %3334 = vmatprep.mubr.msk.f32.mxu0 %vm966_vm2, %v4039_v19 }
 0x9a8   : > { %3332 = vmatprep.subr.msk.mxu0 %vm966_vm2, %v1986_v56 }
 0x9ab   : > { %3333 = vmatpush3.xpose.msk.msra.mxu0 %vm966_vm2, %v1986_v56 }
 0x9ae   : > { %3335 = vmatmul.mubr.msk.f32.vlgmr.msra.gmra.mxu0 %vm966_vm2, %v4081_v29 }
 0xa66   : > { %v3329_v57 = vpop.f32.mrf.mxu0 }
 0xa67   : > { %1984 = vst.msk [vmem:[#allocation2 + $0x18] sm:$0xff] %vm966_vm2, %v3329_v57 }
 0xa68   : > { %v1974_v59 = vpop.f32.mrf.mxu0 }
 0xa69   : > { %1983 = vst.msk [vmem:[#allocation2 + $0x10] sm:$0xff] %vm966_vm2, %v1974_v59 }
 0xa6e   : > { %v3336_v62 = vpop.f32.mrf.mxu0 }
 0xa6f   : > { %v2071_v63 = vsel %vm1054_vm3, %v3336_v62, -inf }
 0xa70   : > { %2072 = vmax.xlane.f32.xlu0 %v2071_v63  ;;  %v2059_v2 = vpop.f32.mrf.mxu0 }
 0xa71   : > { %v2068_v19 = vsel %vm1054_vm3, %v2059_v2, -inf }
 0xa72   : > { %2069 = vmax.xlane.f32.xlu1 %v2068_v19 }
 0xaf9   : > { %v2073_v3 = vpop.xlane.xlu0 %2072 }
 0xafa   : > { %v2075_v4 = vsub.f32 %v3336_v62, %v2073_v3 }
 0xafb   : > { %v2070_v5 = vpop.xlane.xlu1 %2069 }
 0xafc   : > { %v2078_v6 = vmul.f32 1.442695, %v2075_v4  ;;  %v2074_v7 = vsub.f32 %v2059_v2, %v2070_v5 }
 0xafe   : > { %3537 = vpow2.f32 %v2078_v6  ;;  %v2076_v29 = vmul.f32 1.442695, %v2074_v7 }
 0xb00   : > { %3539 = vpow2.f32 %v2076_v29 }
 0xb0b   : > { %v3538_v8 = vpop.eup %3537 }
 0xb0c   : > { %v2083_v9 = vsel %vm1054_vm3, %v3538_v8, 0.0 }
 0xb0d   : > { %v3540_v11 = vpop.eup %3539  ;;  %2084 = vadd.xlane.f32.xlu1 %v2083_v9 }
 0xb0e   : > { %v2080_v12 = vsel %vm1054_vm3, %v3540_v11, 0.0 }
 0xb0f   : > { %2081 = vadd.xlane.f32.xlu0 %v2080_v12 }
 0xb1e   : > { %2094 = vrot.lane.b32.xlu1 %v4173_v61, %s3753_s23 }
 0xb22   : > { %2193 = vrot.lane.b32.xlu1 %v4200_v23, %s3754_s29 }
 0xb25   : > { %2096 = vrot.lane.b32.xlu0 %v4118_v41, %s3753_s23  ;;  %s3756_s23 = smov 8  }
 0xb26   : > { %2191 = vrot.lane.b32.xlu1 %v4207_v31, %s3754_s29 }
 0xb96   : > { %v2085_v13 = vpop.xlane.xlu1 %2084 }
 0xb97   : > { %3541 = vrcp.f32 %v2085_v13 }
 0xb98   : > { %v2082_v14 = vpop.xlane.xlu0 %2081 }
 0xb99   : > { %3543 = vrcp.f32 %v2082_v14 }
 0xb9a   : > { %v2095_v15 = vpop.permute.xlu1 %2094 }
 0xb9c   : > { %v2097_v16 = vpop.permute.xlu0 %2096 }
 0xb9d   : > { %3337 = vmatprep.subr.mxu1 %v2097_v16 }
 0xb9e   : > { %3338 = vmatpush3.msra.mxu1 %v2097_v16  ;;  %v2194_v39 = vpop.permute.xlu1 %2193 }
 0xb9f   : > { %3339 = vmatprep.subr.mxu1 %v2095_v15 }
 0xba0   : > { %3340 = vmatpush3.msra.mxu1 %v2095_v15 }
 0xba1   : > { %3344 = vmatprep.subr.msk.mxu1 %vm966_vm2, %v2194_v39 }
 0xba2   : > { %v2192_v27 = vpop.permute.xlu1 %2191 }
 0xba4   : > { %v3542_v17 = vpop.eup %3541 }
 0xba5   : > { %v2091_v26 = vmul.f32 %v3542_v17, %v3538_v8 }
 0xba6   : > { %v3544_v18 = vpop.eup %3543 }
 0xba7   : > { %v2090_v21 = vmul.f32 %v3544_v18, %v3540_v11  ;;  %v2605_v18 = vld [vmem:[%s4444_s10 + $0x10] sm:$0xff] }
 0xba9   : > { %3341 = vmatprep.mubr.msk.f32.mxu1 %vm1054_vm3, %v2090_v21  ;;  %v2604_v21 = vld [vmem:[%s4444_s10 + $0x8] sm:$0xff] }
 0xbaa   : > { %3342 = vmatmul.mubr.msk.f32.vlgmr.msra.gmra.mxu1 %vm1054_vm3, %v2091_v26 }
 0xbab   : > { %3345 = vmatpush3.xpose.msk.msra.mxu1 %vm966_vm2, %v2194_v39  ;;  %3348 = vmatprep.mubr.msk.f32.mxu1 %vm966_vm2, %v4087_v30 }
 0xbac   : > { %3346 = vmatprep.subr.msk.mxu1 %vm966_vm2, %v2192_v27 }
 0xbaf   : > { %3347 = vmatpush3.xpose.msk.msra.mxu1 %vm966_vm2, %v2192_v27 }
 0xbb2   : > { %3349 = vmatmul.mubr.msk.f32.vlgmr.msra.gmra.mxu1 %vm966_vm2, %v4099_v32 }
 0xc6a   : > { %v4266_v37 = vpop.f32.mrf.mxu1 }
 0xc6c   : > { %v4268_v28 = vpop.f32.mrf.mxu1 }
 0xc72   : > { %v3350_v34 = vpop.f32.mrf.mxu1 }
 0xc73   : > { %v2277_v36 = vsel %vm1054_vm3, %v3350_v34, -inf }
 0xc74   : > { %2278 = vmax.xlane.f32.xlu1 %v2277_v36  ;;  %v2265_v38 = vpop.f32.mrf.mxu1 }
 0xc75   : > { %v2274_v10 = vsel %vm1054_vm3, %v2265_v38, -inf }
 0xc76   : > { %2275 = vmax.xlane.f32.xlu0 %v2274_v10 }
 0xc85   : > { %2298 = vrot.lane.b32.xlu1 %v4173_v61, %s3754_s29 }
 0xc89   : > { %2397 = vrot.lane.b32.xlu1 %v4200_v23, %s3755_s17 }
 0xc8d   : > { %2395 = vrot.lane.b32.xlu1 %v4207_v31, %s3755_s17 }
 0xcfd   : > { %v2279_v30 = vpop.xlane.xlu1 %2278 }
 0xcfe   : > { %v2281_v32 = vsub.f32 %v3350_v34, %v2279_v30  ;;  %v3088_v30 = vld [vmem:[#allocation9] ss:$0 sm:$0xff] }
 0xcff   : > { %v2276_v40 = vpop.xlane.xlu0 %2275 }
 0xd00   : > { %v2284_v42 = vmul.f32 1.442695, %v2281_v32  ;;  %v2280_v43 = vsub.f32 %v2265_v38, %v2276_v40 }
 0xd01   : > { %v2299_v47 = vpop.permute.xlu1 %2298 }
 0xd02   : > { %3545 = vpow2.f32 %v2284_v42  ;;  %v2282_v44 = vmul.f32 1.442695, %v2280_v43 }
 0xd04   : > { %3547 = vpow2.f32 %v2282_v44 }
 0xd05   : > { %v2398_v49 = vpop.permute.xlu1 %2397 }
 0xd09   : > { %v2396_v54 = vpop.permute.xlu1 %2395 }
 0xd0f   : > { %v3546_v45 = vpop.eup %3545 }
 0xd10   : > { %v2289_v22 = vsel %vm1054_vm3, %v3546_v45, 0.0 }
 0xd11   : > { %v3548_v25 = vpop.eup %3547  ;;  %2290 = vadd.xlane.f32.xlu0 %v2289_v22 }
 0xd12   : > { %v2286_v24 = vsel %vm1054_vm3, %v3548_v25, 0.0 }
 0xd15   : > { %2287 = vadd.xlane.f32.xlu0 %v2286_v24 }
 0xd2b   : > { %2300 = vrot.lane.b32.xlu0 %v4118_v41, %s3754_s29  ;;  %s3757_s29 = smov 16  }
 0xd9a   : > { %v2291_v23 = vpop.xlane.xlu0 %2290 }
 0xd9b   : > { %3549 = vrcp.f32 %v2291_v23 }
 0xd9e   : > { %v2288_v31 = vpop.xlane.xlu0 %2287 }
 0xd9f   : > { %3551 = vrcp.f32 %v2288_v31 }
 0xda2   : > { %v2301_v48 = vpop.permute.xlu0 %2300 }
 0xda3   : > { %3351 = vmatprep.subr.mxu0 %v2301_v48 }
 0xda4   : > { %3352 = vmatpush3.msra.mxu0 %v2301_v48 }
 0xda5   : > { %3353 = vmatprep.subr.mxu0 %v2299_v47 }
 0xda6   : > { %3354 = vmatpush3.msra.mxu0 %v2299_v47 }
 0xda7   : > { %3358 = vmatprep.subr.msk.mxu0 %vm966_vm2, %v2398_v49 }
 0xda8   : > { %v3550_v50 = vpop.eup %3549 }
 0xda9   : > { %v2297_v53 = vmul.f32 %v3550_v50, %v3546_v45 }
 0xdac   : > { %v3552_v51 = vpop.eup %3551 }
 0xdad   : > { %v2296_v52 = vmul.f32 %v3552_v51, %v3548_v25 }
 0xdaf   : > { %3355 = vmatprep.mubr.msk.f32.mxu0 %vm1054_vm3, %v2296_v52 }
 0xdb0   : > { %3356 = vmatmul.mubr.msk.f32.vlgmr.msra.gmra.mxu0 %vm1054_vm3, %v2297_v53 }
 0xdb1   : > { %3359 = vmatpush3.xpose.msk.msra.mxu0 %vm966_vm2, %v2398_v49  ;;  %3362 = vmatprep.mubr.msk.f32.mxu0 %vm966_vm2, %v4156_v58 }
 0xdb2   : > { %3360 = vmatprep.subr.msk.mxu0 %vm966_vm2, %v2396_v54 }
 0xdb5   : > { %3361 = vmatpush3.xpose.msk.msra.mxu0 %vm966_vm2, %v2396_v54 }
 0xdb8   : > { %3363 = vmatmul.mubr.msk.f32.vlgmr.msra.gmra.mxu0 %vm966_vm2, %v4168_v60 }
 0xe70   : > { %v3357_v55 = vpop.f32.mrf.mxu0 }
 0xe72   : > { %v2376_v56 = vpop.f32.mrf.mxu0 }
 0xe78   : > { %v3364_v57 = vpop.f32.mrf.mxu0 }
 0xe79   : > { %v2481_v59 = vsel %vm1054_vm3, %v3364_v57, -inf }
 0xe7a   : > { %2482 = vmax.xlane.f32.xlu1 %v2481_v59  ;;  %v2469_v62 = vpop.f32.mrf.mxu0 }
 0xe7b   : > { %v2478_v63 = vsel %vm1054_vm3, %v2469_v62, -inf }
 0xe7c   : > { %2479 = vmax.xlane.f32.xlu0 %v2478_v63  ;;  %v2788_v63 = vld [vmem:[%s4448_s14 + $0x18] sm:$0xff] }
 0xe7d   : > { %3386 = vmatprep.subr.mxu0 %v2788_v63 }
 0xe7e   : > { %3387 = vmatpush3.msra.mxu0 %v2788_v63 }
 0xe8b   : > { %2502 = vrot.lane.b32.xlu1 %v4173_v61, %s3755_s17 }
 0xe8f   : > { %1366 = vrot.lane.b32.xlu1 %v4184_v1, %s3756_s23 }
 0xe93   : > { %1368 = vrot.lane.b32.xlu1 %v4182_v0, %s3756_s23 }
 0xe97   : > { %1579 = vrot.lane.b32.xlu1 %v4186_v35, %s3757_s29 }
 0xe9b   : > { %1790 = vrot.lane.b32.xlu1 %v4220_v33, %s3758_s7 }
 0xe9f   : > { %2185 = vrot.lane.b32.xlu1 %v4266_v37, %s3756_s23  ;;  %v2603_v37 = vld [vmem:[%s4444_s10] sm:$0xff] }
 0xea3   : > { %2389 = vrot.lane.b32.xlu1 %v3357_v55, %s3757_s29 }
 0xf03   : > { %v2483_v58 = vpop.xlane.xlu1 %2482 }
 0xf04   : > { %v2485_v60 = vsub.f32 %v3364_v57, %v2483_v58  ;;  %v2787_v58 = vld [vmem:[%s4448_s14 + $0x10] sm:$0xff] }
 0xf05   : > { %v2480_v61 = vpop.xlane.xlu0 %2479  ;;  %3388 = vmatprep.subr.mxu0 %v2787_v58 }
 0xf06   : > { %v2488_v1 = vmul.f32 1.442695, %v2485_v60  ;;  %v2484_v2 = vsub.f32 %v2469_v62, %v2480_v61  ;;  %v2786_v60 = vld [vmem:[%s4448_s14 + $0x8] sm:$0xff]  ;;  %3389 = vmatpush3.msra.mxu0 %v2787_v58  ;;  %v2785_v61 = vld [vmem:[%s4448_s14] sm:$0xff] }
 0xf07   : > { %v2503_v19 = vpop.permute.xlu1 %2502  ;;  %3390 = vmatprep.subr.mxu0 %v2786_v60 }
 0xf08   : > { %3553 = vpow2.f32 %v2488_v1  ;;  %v2486_v0 = vmul.f32 1.442695, %v2484_v2  ;;  %3391 = vmatpush3.msra.mxu0 %v2786_v60 }
 0xf09   : > { %3392 = vmatprep.subr.mxu0 %v2785_v61 }
 0xf0a   : > { %3555 = vpow2.f32 %v2486_v0  ;;  %3393 = vmatpush3.msra.mxu0 %v2785_v61 }
 0xf0b   : > { %v1367_v35 = vpop.permute.xlu1 %1366 }
 0xf0c   : > { %1373 = vst.msk [vmem:[#allocation2] sm:$0xff] %vm1372_vm4, %v1367_v35 }
 0xf0f   : > { %v1369_v3 = vpop.permute.xlu1 %1368 }
 0xf10   : > { %1374 = vst.msk [vmem:[#allocation2 + $0x8] sm:$0xff] %vm1372_vm4, %v1369_v3 }
 0xf13   : > { %v1580_v33 = vpop.permute.xlu1 %1579 }
 0xf14   : > { %1585 = vst.msk [vmem:[#allocation2 + $0x8] sm:$0xff] %vm1583_vm5, %v1580_v33 }
 0xf15   : > { %v3554_v4 = vpop.eup %3553 }
 0xf16   : > { %v2493_v5 = vsel %vm1054_vm3, %v3554_v4, 0.0 }
 0xf17   : > { %v3556_v6 = vpop.eup %3555  ;;  %v1791_v7 = vpop.permute.xlu1 %1790  ;;  %2494 = vadd.xlane.f32.xlu0 %v2493_v5 }
 0xf18   : > { %1796 = vst.msk [vmem:[#allocation2 + $0x8] sm:$0xff] %vm1794_vm6, %v1791_v7  ;;  %v2490_v29 = vsel %vm1054_vm3, %v3556_v6, 0.0 }
 0xf1b   : > { %v2186_v8 = vpop.permute.xlu1 %2185  ;;  %2491 = vadd.xlane.f32.xlu0 %v2490_v29 }
 0xf1c   : > { %2190 = vst.msk [vmem:[#allocation2 + $0x18] sm:$0xff] %vm1372_vm4, %v2186_v8 }
 0xf1f   : > { %v2390_v9 = vpop.permute.xlu1 %2389 }
 0xf20   : > { %2394 = vst.msk [vmem:[#allocation2 + $0x18] sm:$0xff] %vm1583_vm5, %v2390_v9 }
 0xf31   : > { %2504 = vrot.lane.b32.xlu0 %v4118_v41, %s3755_s17  ;;  %v2606_v41 = vld [vmem:[%s4444_s10 + $0x18] sm:$0xff] }
 0xf35   : > { %1577 = vrot.lane.b32.xlu0 %v4188_v46, %s3757_s29 }
 0xf39   : > { %1788 = vrot.lane.b32.xlu0 %v4222_v20, %s3758_s7 }
 0xf3d   : > { %2183 = vrot.lane.b32.xlu0 %v4268_v28, %s3756_s23  ;;  %v2600_v28 = vld [vmem:[#allocation2 + $0x8] sm:$0xff] }
 0xf41   : > { %2387 = vrot.lane.b32.xlu0 %v2376_v56, %s3757_s29  ;;  %s541_s29 = sand.u32 1, %s3737_s19  }
 0xf42   : > { %s4393_s25 = scalar_lea.sflag [#allocation5], %s541_s29 }
 0xfa0   : > { %v2495_v11 = vpop.xlane.xlu0 %2494 }
 0xfa1   : > { %3557 = vrcp.f32 %v2495_v11 }
 0xfa4   : > { %v2492_v12 = vpop.xlane.xlu0 %2491 }
 0xfa5   : > { %3559 = vrcp.f32 %v2492_v12 }
 0xfa8   : > { %v2505_v13 = vpop.permute.xlu0 %2504 }
 0xfa9   : > { %3365 = vmatprep.subr.mxu1 %v2505_v13 }
 0xfaa   : > { %3366 = vmatpush3.msra.mxu1 %v2505_v13 }
 0xfab   : > { %3367 = vmatprep.subr.mxu1 %v2503_v19 }
 0xfac   : > { %3368 = vmatpush3.msra.mxu1 %v2503_v19  ;;  %v1578_v46 = vpop.permute.xlu0 %1577 }
 0xfad   : > { %1584 = vst.msk [vmem:[#allocation2] sm:$0xff] %vm1583_vm5, %v1578_v46  ;;  %3372 = vmatprep.subr.mxu1 %v2606_v41  ;;  %v3093_v46 = vld [vmem:[%s4446_s12] ss:$0 sm:$0xff] }
 0xfae   : > { %v3558_v14 = vpop.eup %3557 }
 0xfaf   : > { %v2501_v17 = vmul.f32 %v3558_v14, %v3554_v4 }
 0xfb0   : > { %v1789_v20 = vpop.permute.xlu0 %1788 }
 0xfb1   : > { %1795 = vst.msk [vmem:[#allocation2] sm:$0xff] %vm1794_vm6, %v1789_v20 }
 0xfb2   : > { %v3560_v15 = vpop.eup %3559 }
 0xfb3   : > { %v2500_v16 = vmul.f32 %v3560_v15, %v3556_v6 }
 0xfb4   : > { %v2184_v39 = vpop.permute.xlu0 %2183 }
 0xfb5   : > { %2189 = vst.msk [vmem:[#allocation2 + $0x10] sm:$0xff] %vm1372_vm4, %v2184_v39  ;;  %3369 = vmatprep.mubr.msk.f32.mxu1 %vm1054_vm3, %v2500_v16  ;;  %v3094_v16 = vld [vmem:[%s4447_s13] ss:$0 sm:$0xff] }
 0xfb6   : > { %3370 = vmatmul.mubr.msk.f32.vlgmr.msra.gmra.mxu1 %vm1054_vm3, %v2501_v17 }
 0xfb7   : > { %3373 = vmatpush3.msra.mxu1 %v2606_v41 }
 0xfb8   : > { %3374 = vmatprep.subr.mxu1 %v2605_v18  ;;  %v2388_v26 = vpop.permute.xlu0 %2387  ;;  %v2599_v27 = vld [vmem:[#allocation2] sm:$0xff] }
 0xfb9   : > { %3375 = vmatpush3.msra.mxu1 %v2605_v18  ;;  %2393 = vst.msk [vmem:[#allocation2 + $0x10] sm:$0xff] %vm1583_vm5, %v2388_v26  ;;  %3380 = vmatprep.mubr.msk.f32.mxu1 %vm662_vm1, %v2599_v27 }
 0xfba   : > { %3376 = vmatprep.subr.mxu1 %v2604_v21 }
 0xfbb   : > { %3377 = vmatpush3.msra.mxu1 %v2604_v21 }
 0xfbc   : > { %3378 = vmatprep.subr.mxu1 %v2603_v37 }
 0xfbd   : > { %3379 = vmatpush3.msra.mxu1 %v2603_v37 }
 0xfbe   : > { %3381 = vmatmul.mubr.msk.f32.vlgmr.msra.gmra.mxu1 %vm662_vm1, %v2600_v28 }
0x1076   : > { %v3371_v34 = vpop.f32.mrf.mxu1 }
0x1077   : > { %2593 = vrot.lane.b32.xlu1 %v3371_v34, %s3758_s7 }
0x1078   : > { %v2580_v36 = vpop.f32.mrf.mxu1 }
0x1079   : > { %2591 = vrot.lane.b32.xlu0 %v2580_v36, %s3758_s7  ;;  %s3020_s7 = sshll.u32 %s541_s29, 5 }
0x107a   : > { %s543_s18 = scalar_lea.vmem [#allocation11], %s3020_s7  ;;  %s3679_s7 = scalar_lea.vmem %s3678_s16, 1024 }
0x107b   : > { %s2905_s20 = sshll.u32 %s543_s18, 4  ;;  %s4384_s20 = int_to_ptr.vmem [resolvable:$true] %s2905_s20 }
0x107c   : > { %s3673_s24 = scalar_lea.vmem %s4384_s20, 512  ;;  %p3680_p4 = scmp.lt.s32.totalorder %s4384_s20, %s3678_s16 }
0x107d   : > { %p3674_p9 = scmp.ne.s32.totalorder %s4384_s20, %s3673_s24  ;;  %p3681_p7 = scmp.lt.s32.totalorder %s3679_s7, %s3673_s24 }
0x107e   : > { %v3382_v38 = vpop.f32.mrf.mxu1 }
0x107f   : > { %v2698_v40 = vadd.f32 %v3382_v38, %v3088_v30  ;;  %p3675_p12 = pnand %p3674_p9, %p3879_p5  ;;  %p3682_p8 = por %p3681_p7, %p3680_p4 }
0x1080   : > { %v2692_v10 = vpop.f32.mrf.mxu1 }
0x1081   : > { %v2693_v32 = vadd.f32 %v3088_v30, %v2692_v10  ;;  %v2716_v43 = vsel %vm662_vm1, %v2698_v40, 0.0  ;;  %p3676_p13 = pneg %p3675_p12 }
0x1083   : > { %v2713_v42 = vsel %vm662_vm1, %v2693_v32, 0.0  ;;  %p3683_p11 = pnand %p3682_p8, %p3676_p13 }
0x1098   : > { %2714 = vadd.xlane.f32.xlu0 %v2713_v42 }
0x109b   : > { %2717 = vadd.xlane.f32.xlu1 %v2716_v43 }
0x10e9   : > { %v2594_v44 = vpop.permute.xlu1 %2593 }
0x10ea   : > { %2598 = vst.msk [vmem:[#allocation2 + $0x18] sm:$0xff] %vm1794_vm6, %v2594_v44 }
0x10eb   : > { %v2592_v45 = vpop.permute.xlu0 %2591 }
0x10ec   : > { %2597 = vst.msk [vmem:[#allocation2 + $0x10] sm:$0xff] %vm1794_vm6, %v2592_v45 }
0x10f1   : > { %v2602_v25 = vld [vmem:[#allocation2 + $0x18] sm:$0xff] }
0x10f3   : > { %v2601_v22 = vld [vmem:[#allocation2 + $0x10] sm:$0xff] }
0x10f4   : > { %3383 = vmatprep.mubr.msk.f32.mxu1 %vm662_vm1, %v2601_v22 }
0x10f5   : > { %3384 = vmatmul.mubr.msk.f32.gmra.mxu1 %vm662_vm1, %v2602_v25 }
0x1121   : > { %v2715_v49 = vpop.xlane.xlu0 %2714 }
0x1122   : > { %v2725_v51 = vmul.f32 0.03125, %v2715_v49 }
0x1124   : > { %v2718_v24 = vpop.xlane.xlu1 %2717  ;;  %v2729_v54 = vsub.f32 %v2693_v32, %v2725_v51 }
0x1125   : > { %v2726_v23 = vmul.f32 0.03125, %v2718_v24 }
0x1126   : > { %v2733_v59 = vmul.f32 %v2729_v54, %v2729_v54 }
0x1127   : > { %v2730_v31 = vsub.f32 %v2698_v40, %v2726_v23 }
0x1128   : > { %v2737_v62 = vsel %vm662_vm1, %v2733_v59, 0.0 }
0x1129   : > { %v2734_v47 = vmul.f32 %v2730_v31, %v2730_v31 }
0x112b   : > { %v2740_v48 = vsel %vm662_vm1, %v2734_v47, 0.0 }
0x112c   : > { %2741 = vadd.xlane.f32.xlu1 %v2740_v48 }
0x11b5   : > { %v3385_v50 = vpop.f32.mrf.mxu1  ;;  %v2742_v1 = vpop.xlane.xlu1 %2741 }
0x11b6   : > { %v2708_v55 = vadd.f32 %v3385_v50, %v3088_v30  ;;  %v2750_v2 = vmul.f32 0.03125, %v2742_v1 }
0x11b7   : > { %v2702_v52 = vpop.f32.mrf.mxu1 }
0x11b8   : > { %v2703_v53 = vadd.f32 %v3088_v30, %v2702_v52  ;;  %v2722_v57 = vsel %vm662_vm1, %v2708_v55, 0.0  ;;  %v2754_v3 = vadd.f32 1e-06, %v2750_v2 }
0x11ba   : > { %v2719_v56 = vsel %vm662_vm1, %v2703_v53, 0.0  ;;  %3561 = vrsqrt.f32 %v2754_v3 }
0x11bb   : > { %2720 = vadd.xlane.f32.xlu0 %v2719_v56 }
0x11bf   : > { %2723 = vadd.xlane.f32.xlu0 %v2722_v57 }
0x11c3   : > { %2738 = vadd.xlane.f32.xlu0 %v2737_v62 }
0x11c7   : > { %v3562_v13 = vpop.eup %3561 }
0x11c8   : > { %v2762_v41 = vmul.f32 %v3562_v13, %v2730_v31 }
0x11ca   : > { %v2772_v15 = vmul.f32 %v3093_v46, %v2762_v41 }
0x11cc   : > { %v2782_v18 = vadd.f32 %v3094_v16, %v2772_v15 }
0x1244   : > { %v2721_v19 = vpop.xlane.xlu0 %2720 }
0x1245   : > { %v2727_v0 = vmul.f32 0.03125, %v2721_v19 }
0x1247   : > { %v2731_v35 = vsub.f32 %v2703_v53, %v2727_v0 }
0x1248   : > { %v2724_v33 = vpop.xlane.xlu0 %2723 }
0x1249   : > { %v2728_v4 = vmul.f32 0.03125, %v2724_v33  ;;  %v2735_v5 = vmul.f32 %v2731_v35, %v2731_v35 }
0x124b   : > { %v2732_v6 = vsub.f32 %v2708_v55, %v2728_v4  ;;  %v2743_v7 = vsel %vm662_vm1, %v2735_v5, 0.0 }
0x124c   : > { %2744 = vadd.xlane.f32.xlu0 %v2743_v7  ;;  %v2739_v29 = vpop.xlane.xlu0 %2738 }
0x124d   : > { %v2749_v8 = vmul.f32 0.03125, %v2739_v29  ;;  %v2736_v9 = vmul.f32 %v2732_v6, %v2732_v6 }
0x124f   : > { %v2753_v11 = vadd.f32 1e-06, %v2749_v8  ;;  %v2746_v12 = vsel %vm662_vm1, %v2736_v9, 0.0 }
0x1250   : > { %2747 = vadd.xlane.f32.xlu1 %v2746_v12 }
0x1251   : > { %3563 = vrsqrt.f32 %v2753_v11 }
0x125e   : > { %v3564_v20 = vpop.eup %3563 }
0x125f   : > { %v2761_v14 = vmul.f32 %v3564_v20, %v2729_v54 }
0x1261   : > { %v2771_v39 = vmul.f32 %v3093_v46, %v2761_v14 }
0x1263   : > { %v2781_v17 = vadd.f32 %v3094_v16, %v2771_v39 }
0x1265   : > { %3394 = vmatprep.mubr.msk.f32.mxu0 %vm662_vm1, %v2781_v17 }
0x1266   : > { %3395 = vmatmul.mubr.msk.f32.vlgmr.msra.gmra.mxu0 %vm662_vm1, %v2782_v18 }
0x12d5   : > { %v2745_v21 = vpop.xlane.xlu0 %2744 }
0x12d6   : > { %v2751_v26 = vmul.f32 0.03125, %v2745_v21 }
0x12d8   : > { %v2755_v27 = vadd.f32 1e-06, %v2751_v26 }
0x12d9   : > { %v2748_v37 = vpop.xlane.xlu1 %2747 }
0x12da   : > { %3565 = vrsqrt.f32 %v2755_v27  ;;  %v2752_v28 = vmul.f32 0.03125, %v2748_v37 }
0x12dc   : > { %v2756_v34 = vadd.f32 1e-06, %v2752_v28 }
0x12de   : > { %3567 = vrsqrt.f32 %v2756_v34 }
0x12e7   : > { %v3566_v36 = vpop.eup %3565 }
0x12e8   : > { %v2763_v38 = vmul.f32 %v3566_v36, %v2731_v35 }
0x12ea   : > { %v2773_v10 = vmul.f32 %v3093_v46, %v2763_v38 }
0x12eb   : > { %v3568_v30 = vpop.eup %3567 }
0x12ec   : > { %v2783_v32 = vadd.f32 %v3094_v16, %v2773_v10  ;;  %v2764_v40 = vmul.f32 %v3568_v30, %v2732_v6 }
0x12ee   : > { %3397 = vmatprep.mubr.msk.f32.mxu0 %vm662_vm1, %v2783_v32  ;;  %v2774_v42 = vmul.f32 %v3093_v46, %v2764_v40 }
0x12f0   : > { %v2784_v43 = vadd.f32 %v3094_v16, %v2774_v42 }
0x12f2   : > { %3398 = vmatmul.mubr.msk.f32.gmra.mxu0 %vm662_vm1, %v2784_v43 }
0x1326   : > { %v3396_v44 = vpop.f32.mrf.mxu0 }
0x1327   : > { %2887 = vst.msk [vmem:[%s543_s18 + $0x8] sm:$0xff] %vm662_vm1, %v3396_v44 }
0x1328   : > { %v2867_v45 = vpop.f32.mrf.mxu0 }
0x1329   : > { %2886 = vst.msk [vmem:[%s543_s18] sm:$0xff] %vm662_vm1, %v2867_v45 }
0x13b2   : > { %v3399_v22 = vpop.f32.mrf.mxu0 }
0x13b3   : > { %2889 = vst.msk [vmem:[%s543_s18 + $0x18] sm:$0xff] %vm662_vm1, %v3399_v22 }
0x13b4   : > { %v2877_v25 = vpop.f32.mrf.mxu0 }
0x13b5   : > { %2888 = vst.msk [vmem:[%s543_s18 + $0x10] sm:$0xff] %vm662_vm1, %v2877_v25 }
0x13b6   : > { %3686 = shalt.err (!%p3683_p11)
}
0x13b7   : > { %s3687_s29 = scalar_lea.hbm %s4390_s27, 512  ;;  %s3691_s26 = scalar_lea.hbm %s4449_s15, 1024 }
0x13b8   : > { %p3688_p1 = scmp.ne.s32.totalorder %s4390_s27, %s3687_s29  ;;  %p3692_p2 = scmp.lt.s32.totalorder %s4390_s27, %s4449_s15 }
0x13b9   : > { %p3693_p10 = scmp.lt.s32.totalorder %s3691_s26, %s3687_s29 }
0x13ba   : > { %p3689_p0 = pnand %p3688_p1, %p3879_p5 }
0x13bb   : > { %p3694_p9 = por %p3693_p10, %p3692_p2 }
0x13bc   : > { %p3690_p3 = pneg %p3689_p0 }
0x13be   : > { %p3695_p12 = pnand %p3694_p9, %p3690_p3 }
0x13c0   : > { %3698 = shalt.err (!%p3695_p12)
}
0x13c1   : > { %s3760_s24 = smov 128  }
0x13c2   : > { %3416 = dma.vmem_to_hbm [thread:$0]  (%p3879_p5), %s4384_s20, 512, %s4390_s27, %s4393_s25, %s3760_s24, %s3760_s24, %s3756_s23  }
0x13c3 PF: > { %s4466_s16 = sld [smem:[#allocation16_spill]]  ;;  %p3443_p13 = scmp.ge.s32.totalorder %s3745_s21, 2 }
0x13c5   : > { %p3432_p4 = pnand %p3443_p13, %p3883_p6 }
0x13c7   : > { %p3433_p7 = pneg %p3432_p4 }
0x13c9   : > { %s2920_s18 = sand.u32 1, %s4466_s16  }
0x13ca   : > { %s2921_s29 = scalar_lea.sflag [#allocation5], %s2920_s18 }
0x13cb   : > { %3728 = dma.done.wait (%p3433_p7), %s2921_s29, 512  }
0x13cc   : > { %3730 = vsyncadd (%p3433_p7), %s2921_s29, 4294966784  ;;  %s4468_s21 = sld [smem:[#allocation18_spill]]  ;;  %s4471_s18 = smov %s3737_s19 }
0x13cd   : > { %s4469_s28 = sld [smem:[#allocation17_spill]] }
0x13ce   : > { %s4470_s20 = sld [smem:[#allocation19_spill]] }
0x13d2   : > { %p28_p8 = scmp.ge.s32.totalorder %s4468_s21, 4  }
0x13d3   : > { %s4472_s19 = smov %s4469_s28 }
0x13d4   :  { %30 = sbr.rel (!%p28_p8) target bundleno = 8 (0x8), region = 132 }
0x13d9   :  { %2926 = vsyncpa [#allocation4], 1 }
0x13da   :  { %2928 = vsyncpa [#allocation4 + $0x1], 1 }
0x13db   :  { %2929 = vsyncpa [#allocation7], 1 }
0x13dc   :  { %2930 = vsyncpa [#allocation10], 1 }
0x13dd   :  { %2931 = vsyncpa [#allocation5], 1 }
0x13de   :  { %2933 = vsyncpa [#allocation5 + $0x1], 1 }

</bundles_post_ra>
